<compile_context>
chip_gen: v7x
topology: tpu7x:2x2x1
jax: 0.10.0
libtpu: 0.0.40
codegen_flags: <defaults>
</compile_context>

<pallas_src>
import functools

import jax
import jax.numpy as jnp
from jax.experimental import pallas as pl
from jax.experimental.pallas import tpu as pltpu  # noqa: F401  (TPU backend)

# ----------------------------- problem sizes -----------------------------
INPUT_DIM = 16     # feature dim D
OUTPUT_DIM = 8     # label dim C
K = 5              # neighbours
NQ = 64            # queries (multiple of 8 sublanes)
ND = 128           # database points (fills the 128-lane axis)


# ------------------------------ Pallas kernel ----------------------------
def knn_kernel(q_ref, db_ref, lab_ref, out_ref, *, k):
    # q_ref  : (Nq, D)   f32
    # db_ref : (Nd, D)   f32
    # lab_ref: (Nd, C)   f32
    # out_ref: (Nq, C)   f32
    q = q_ref[...]
    db = db_ref[...]
    nq = q.shape[0]
    nd = db.shape[0]

    # q . db^T via dot_general contracting D on both sides (no transpose).
    cross = jax.lax.dot_general(
        q, db, (((1,), (1,)), ((), ())),
        preferred_element_type=jnp.float32)                      # (Nq, Nd)

    # ||db||^2 as a lane-aligned (1, Nd) row, produced on the (otherwise idle)
    # MXU so no sublane->lane relayout is needed.
    ones_row = jnp.ones((1, db.shape[1]), jnp.float32)
    d_sq = jax.lax.dot_general(
        ones_row, db * db, (((1,), (1,)), ((), ())),
        preferred_element_type=jnp.float32)                      # (1, Nd)

    # Same per-row ordering as cdist(q, db)^2 (dropped ||q||^2 is a per-row
    # constant; sqrt is monotone).
    scores = d_sq - 2.0 * cross                                  # (Nq, Nd)

    # Hoisted loop invariants (JAX does not CSE broadcast_in_dim).
    col_ids = jax.lax.broadcasted_iota(jnp.int32, (nq, nd), 1)
    inf_tile = jnp.full((nq, nd), jnp.inf, jnp.float32)
    sentinel = jnp.full((nq, nd), nd, jnp.int32)

    sel = jnp.zeros((nq, nd), jnp.float32)      # one-hot selections, summed
    d = scores
    # k is small & static -> unrolled.  Each iteration: row-min (XLU), pick
    # the lowest-index column attaining it, add it to the selection matrix and
    # mask ONLY that column — so duplicates can be re-selected, matching
    # torch.topk's multiset of the k smallest distances.
    for _ in range(k):
        mn = jnp.min(d, axis=1, keepdims=True)                   # (Nq, 1)
        is_min = d == mn
        idx = jnp.min(jnp.where(is_min, col_ids, sentinel),
                      axis=1, keepdims=True)                     # (Nq, 1)
        selected = col_ids == idx
        sel = sel + selected.astype(jnp.float32)
        d = jnp.where(selected, inf_tile, d)

    # gather(labels)[top-k].mean()  ==  (sel @ labels) / k   (MXU matmul).
    preds = jnp.dot(sel, lab_ref[...], preferred_element_type=jnp.float32)
    out_ref[...] = (preds * (1.0 / k)).astype(out_ref.dtype)


# ------------------------------- wrapper ----------------------------------
def knn_forward(query, database, database_labels, k=K):
    nq, d_in = query.shape
    nd, c = database_labels.shape
    assert database.shape == (nd, d_in)
    assert nd >= k, "need at least k database points"

    # Single invocation, no grid: full operands (a few KiB each) live in VMEM.
    # This removes per-grid-step pipeline overhead (1 TC on v5e/v6e) and all
    # wrapper-side prep launches; raw inputs are passed straight through.
    # NOTE: output last dim C=8 < 128 lanes -> masked stores, but the whole
    # output is 2 KiB; repack lane-dense only if Nq / C scale up.
    return pl.pallas_call(
        functools.partial(knn_kernel, k=k),
        out_shape=jax.ShapeDtypeStruct((nq, c), jnp.float32),
    )(query, database, database_labels)


# ----------------------------- pure-JAX reference -------------------------
def knn_ref(query, database, database_labels, k):
    diff = query[:, None, :] - database[None, :, :]
    dist = jnp.sqrt(jnp.sum(diff * diff, axis=-1))
    idx = jnp.argsort(dist, axis=1)[:, :k]
    return jnp.mean(database_labels[idx], axis=1)


# ---------------------------------- main ----------------------------------
if __name__ == "__main__":
    key = jax.random.PRNGKey(0)
    kq, kd, kl, kw = jax.random.split(key, 4)

    query = jax.random.normal(kq, (NQ, INPUT_DIM), jnp.float32)
    database = jax.random.normal(kd, (ND, INPUT_DIM), jnp.float32)
    database_labels = jax.random.normal(kl, (ND, OUTPUT_DIM), jnp.float32)

    # nn.Linear(input_dim, output_dim) parameters — created for completeness;
    # TODO(synk): self.linear is never applied in the reference forward pass.
    linear_w = jax.random.normal(kw, (OUTPUT_DIM, INPUT_DIM), jnp.float32) * 0.02
    linear_b = jnp.zeros((OUTPUT_DIM,), jnp.float32)

    out = jax.block_until_ready(knn_forward(query, database, database_labels))
    ref = knn_ref(query, database, database_labels, K)

    assert out.shape == (NQ, OUTPUT_DIM)
    assert jnp.allclose(out, ref, rtol=1e-4, atol=1e-4), (
        f"mismatch: max abs err = {jnp.max(jnp.abs(out - ref))}")

    print("KERNEL_OK")
</pallas_src>

<mosaic_0001>
module attributes {stable_mosaic.version = 11 : i64} {
  func.func @knn_kernel(%arg0: memref<64x16xf32, #tpu.memory_space<vmem>>, %arg1: memref<128x16xf32, #tpu.memory_space<vmem>>, %arg2: memref<128x8xf32, #tpu.memory_space<vmem>>, %arg3: memref<64x8xf32, #tpu.memory_space<vmem>>) attributes {dimension_semantics = [], scalar_prefetch = 0 : i64, scratch_operands = 0 : i64, tpu.core_type = #tpu.core_type<tc>} {
    %c0 = arith.constant 0 : index
    %c0_0 = arith.constant 0 : index
    %0 = vector.load %arg0[%c0, %c0_0] : memref<64x16xf32, #tpu.memory_space<vmem>>, vector<64x16xf32>
    %c0_1 = arith.constant 0 : index
    %c0_2 = arith.constant 0 : index
    %1 = vector.load %arg1[%c0_1, %c0_2] : memref<128x16xf32, #tpu.memory_space<vmem>>, vector<128x16xf32>
    %cst = arith.constant dense<0.000000e+00> : vector<64x128xf32>
    %2 = tpu.matmul %0, %1, %cst {dimension_numbers = #tpu.dot_dimension_numbers<[1], [1], [0], [0], [0, 0, 1, 0], [], []>} : vector<64x16xf32>, vector<128x16xf32>, vector<64x128xf32> -> vector<64x128xf32>
    %cst_3 = arith.constant 1.000000e+00 : f32
    %3 = vector.broadcast %cst_3 : f32 to vector<1x16xf32>
    %4 = arith.mulf %1, %1 : vector<128x16xf32>
    %cst_4 = arith.constant dense<0.000000e+00> : vector<1x128xf32>
    %5 = tpu.matmul %3, %4, %cst_4 {dimension_numbers = #tpu.dot_dimension_numbers<[1], [1], [0], [0], [0, 0, 1, 0], [], []>} : vector<1x16xf32>, vector<128x16xf32>, vector<1x128xf32> -> vector<1x128xf32>
    %cst_5 = arith.constant 2.000000e+00 : f32
    %6 = vector.broadcast %cst_5 : f32 to vector<64x128xf32>
    %7 = arith.mulf %6, %2 : vector<64x128xf32>
    %8 = vector.broadcast %5 : vector<1x128xf32> to vector<64x128xf32>
    %9 = arith.subf %8, %7 : vector<64x128xf32>
    %10 = tpu.iota {dimensions = array<i32: 1>} : vector<64x128xi32>
    %cst_6 = arith.constant 0x7F800000 : f32
    %11 = vector.broadcast %cst_6 : f32 to vector<64x128xf32>
    %c128_i32 = arith.constant 128 : i32
    %12 = vector.broadcast %c128_i32 : i32 to vector<64x128xi32>
    %cst_7 = arith.constant 0.000000e+00 : f32
    %13 = vector.broadcast %cst_7 : f32 to vector<64x128xf32>
    %cst_8 = arith.constant dense<0x7F800000> : vector<64xf32>
    %14 = vector.multi_reduction <minimumf>, %9, %cst_8 [1] : vector<64x128xf32> to vector<64xf32>
    %15 = vector.shape_cast %14 : vector<64xf32> to vector<64x1xf32>
    %16 = vector.broadcast %15 : vector<64x1xf32> to vector<64x128xf32>
    %17 = arith.cmpf oeq, %9, %16 : vector<64x128xf32>
    %18 = arith.select %17, %10, %12 : vector<64x128xi1>, vector<64x128xi32>
    %cst_9 = arith.constant dense<2147483647> : vector<64xi32>
    %19 = vector.multi_reduction <minsi>, %18, %cst_9 [1] : vector<64x128xi32> to vector<64xi32>
    %20 = vector.shape_cast %19 : vector<64xi32> to vector<64x1xi32>
    %21 = vector.broadcast %20 : vector<64x1xi32> to vector<64x128xi32>
    %22 = arith.cmpi eq, %10, %21 : vector<64x128xi32>
    %23 = arith.extui %22 : vector<64x128xi1> to vector<64x128xi32>
    %24 = arith.sitofp %23 : vector<64x128xi32> to vector<64x128xf32>
    %25 = arith.addf %13, %24 : vector<64x128xf32>
    %26 = arith.select %22, %11, %9 : vector<64x128xi1>, vector<64x128xf32>
    %cst_10 = arith.constant dense<0x7F800000> : vector<64xf32>
    %27 = vector.multi_reduction <minimumf>, %26, %cst_10 [1] : vector<64x128xf32> to vector<64xf32>
    %28 = vector.shape_cast %27 : vector<64xf32> to vector<64x1xf32>
    %29 = vector.broadcast %28 : vector<64x1xf32> to vector<64x128xf32>
    %30 = arith.cmpf oeq, %26, %29 : vector<64x128xf32>
    %31 = arith.select %30, %10, %12 : vector<64x128xi1>, vector<64x128xi32>
    %cst_11 = arith.constant dense<2147483647> : vector<64xi32>
    %32 = vector.multi_reduction <minsi>, %31, %cst_11 [1] : vector<64x128xi32> to vector<64xi32>
    %33 = vector.shape_cast %32 : vector<64xi32> to vector<64x1xi32>
    %34 = vector.broadcast %33 : vector<64x1xi32> to vector<64x128xi32>
    %35 = arith.cmpi eq, %10, %34 : vector<64x128xi32>
    %36 = arith.extui %35 : vector<64x128xi1> to vector<64x128xi32>
    %37 = arith.sitofp %36 : vector<64x128xi32> to vector<64x128xf32>
    %38 = arith.addf %25, %37 : vector<64x128xf32>
    %39 = arith.select %35, %11, %26 : vector<64x128xi1>, vector<64x128xf32>
    %cst_12 = arith.constant dense<0x7F800000> : vector<64xf32>
    %40 = vector.multi_reduction <minimumf>, %39, %cst_12 [1] : vector<64x128xf32> to vector<64xf32>
    %41 = vector.shape_cast %40 : vector<64xf32> to vector<64x1xf32>
    %42 = vector.broadcast %41 : vector<64x1xf32> to vector<64x128xf32>
    %43 = arith.cmpf oeq, %39, %42 : vector<64x128xf32>
    %44 = arith.select %43, %10, %12 : vector<64x128xi1>, vector<64x128xi32>
    %cst_13 = arith.constant dense<2147483647> : vector<64xi32>
    %45 = vector.multi_reduction <minsi>, %44, %cst_13 [1] : vector<64x128xi32> to vector<64xi32>
    %46 = vector.shape_cast %45 : vector<64xi32> to vector<64x1xi32>
    %47 = vector.broadcast %46 : vector<64x1xi32> to vector<64x128xi32>
    %48 = arith.cmpi eq, %10, %47 : vector<64x128xi32>
    %49 = arith.extui %48 : vector<64x128xi1> to vector<64x128xi32>
    %50 = arith.sitofp %49 : vector<64x128xi32> to vector<64x128xf32>
    %51 = arith.addf %38, %50 : vector<64x128xf32>
    %52 = arith.select %48, %11, %39 : vector<64x128xi1>, vector<64x128xf32>
    %cst_14 = arith.constant dense<0x7F800000> : vector<64xf32>
    %53 = vector.multi_reduction <minimumf>, %52, %cst_14 [1] : vector<64x128xf32> to vector<64xf32>
    %54 = vector.shape_cast %53 : vector<64xf32> to vector<64x1xf32>
    %55 = vector.broadcast %54 : vector<64x1xf32> to vector<64x128xf32>
    %56 = arith.cmpf oeq, %52, %55 : vector<64x128xf32>
    %57 = arith.select %56, %10, %12 : vector<64x128xi1>, vector<64x128xi32>
    %cst_15 = arith.constant dense<2147483647> : vector<64xi32>
    %58 = vector.multi_reduction <minsi>, %57, %cst_15 [1] : vector<64x128xi32> to vector<64xi32>
    %59 = vector.shape_cast %58 : vector<64xi32> to vector<64x1xi32>
    %60 = vector.broadcast %59 : vector<64x1xi32> to vector<64x128xi32>
    %61 = arith.cmpi eq, %10, %60 : vector<64x128xi32>
    %62 = arith.extui %61 : vector<64x128xi1> to vector<64x128xi32>
    %63 = arith.sitofp %62 : vector<64x128xi32> to vector<64x128xf32>
    %64 = arith.addf %51, %63 : vector<64x128xf32>
    %65 = arith.select %61, %11, %52 : vector<64x128xi1>, vector<64x128xf32>
    %cst_16 = arith.constant dense<0x7F800000> : vector<64xf32>
    %66 = vector.multi_reduction <minimumf>, %65, %cst_16 [1] : vector<64x128xf32> to vector<64xf32>
    %67 = vector.shape_cast %66 : vector<64xf32> to vector<64x1xf32>
    %68 = vector.broadcast %67 : vector<64x1xf32> to vector<64x128xf32>
    %69 = arith.cmpf oeq, %65, %68 : vector<64x128xf32>
    %70 = arith.select %69, %10, %12 : vector<64x128xi1>, vector<64x128xi32>
    %cst_17 = arith.constant dense<2147483647> : vector<64xi32>
    %71 = vector.multi_reduction <minsi>, %70, %cst_17 [1] : vector<64x128xi32> to vector<64xi32>
    %72 = vector.shape_cast %71 : vector<64xi32> to vector<64x1xi32>
    %73 = vector.broadcast %72 : vector<64x1xi32> to vector<64x128xi32>
    %74 = arith.cmpi eq, %10, %73 : vector<64x128xi32>
    %75 = arith.extui %74 : vector<64x128xi1> to vector<64x128xi32>
    %76 = arith.sitofp %75 : vector<64x128xi32> to vector<64x128xf32>
    %77 = arith.addf %64, %76 : vector<64x128xf32>
    %c0_18 = arith.constant 0 : index
    %c0_19 = arith.constant 0 : index
    %78 = vector.load %arg2[%c0_18, %c0_19] : memref<128x8xf32, #tpu.memory_space<vmem>>, vector<128x8xf32>
    %cst_20 = arith.constant dense<0.000000e+00> : vector<64x8xf32>
    %79 = tpu.matmul %77, %78, %cst_20 {dimension_numbers = #tpu.dot_dimension_numbers<[1], [0], [0], [1], [0, 0, 1, 1], [], []>} : vector<64x128xf32>, vector<128x8xf32>, vector<64x8xf32> -> vector<64x8xf32>
    %cst_21 = arith.constant 2.000000e-01 : f32
    %80 = vector.broadcast %cst_21 : f32 to vector<64x8xf32>
    %81 = arith.mulf %79, %80 : vector<64x8xf32>
    %c0_22 = arith.constant 0 : index
    %c0_23 = arith.constant 0 : index
    %82 = vector.load %arg3[%c0_22, %c0_23] : memref<64x8xf32, #tpu.memory_space<vmem>>, vector<64x8xf32>
    tpu.vector_store %arg3[%c0_22, %c0_23], %81 {strides = array<i32>} : memref<64x8xf32, #tpu.memory_space<vmem>>, vector<64x8xf32>,
    return
  }
}

</mosaic_0001>

<bundles_post_ra>
// kernel: tpu_custom_call.1
= control target key start
LH: loop header
LB: loop body
LE: loop exit
PB: predicated region body
PF: predicated region fallthrough
CT: control target
= control target key end

     0   :  { %vm38_vm0 = vcmask 130048   ;;  %v1830_v3 = vmov 0.0|0.0   ;;  %vm1831_vm2 = vmmov 0   ;;  %v1832_v4 = vmov 0.0   ;;  %s2620_s1 = inlined_call_operand.vmem [shape: f32[128,16], index: 1, kind: input, shape index: {}]   ;;  %s2621_s0 = inlined_call_operand.vmem [shape: f32[64,16], index: 0, kind: input, shape index: {}]   ;;  %s2622_s2 = inlined_call_operand.vmem [shape: f32[128,8], index: 2, kind: input, shape index: {}]   ;;  %s2623_s3 = inlined_call_operand.vmem [shape: f32[64,8], index: 3, kind: output, shape index: {}]  }
   0x1   :  { %v22_v0 = vld [vmem:[%s2620_s1] sm:$0xff]  ;;  %v23_v1 = vld [vmem:[%s2620_s1 + $0x8] sm:$0xff]  ;;  %vm1862_vm1 = vmpackc.low %vm38_vm0, %vm38_vm0  ;;  %1746 = vmatprep.subr.bf16.mxu1 %v1830_v3  ;;  %1651 = vmatprep.mubr.msk.f32.mxu1 %vm1831_vm2, %v1832_v4  ;;  %v1833_v54 = vmov 1.0   ;;  %v361_v60 = vlaneseq }
   0x2   :  { %v1698_v5 = vpack.c.bf16 %v23_v1, %v22_v0  ;;  %v216_v6 = vmul.f32 %v22_v0, %v22_v0  ;;  %v217_v7 = vmul.f32 %v23_v1, %v23_v1  ;;  %v24_v8 = vld [vmem:[%s2620_s1 + $0x10] sm:$0xff]  ;;  %v25_v9 = vld [vmem:[%s2620_s1 + $0x18] sm:$0xff]  ;;  %v14_v14 = vld [vmem:[%s2621_s0] sm:$0xff] }
   0x3   :  { %v1704_v10 = vpack.c.bf16 %v25_v9, %v24_v8  ;;  %v218_v12 = vmul.f32 %v24_v8, %v24_v8  ;;  %v219_v13 = vmul.f32 %v25_v9, %v25_v9  ;;  %v26_v15 = vld [vmem:[%s2620_s1 + $0x20] sm:$0xff]  ;;  %v27_v16 = vld [vmem:[%s2620_s1 + $0x28] sm:$0xff]  ;;  %1607 = vmatprep.mubr.msk.f32.mxu0 %vm38_vm0, %v14_v14  ;;  %v28_v21 = vld [vmem:[%s2620_s1 + $0x30] sm:$0xff]  ;;  %v362_v61 = vshrl.u32 %v361_v60, 7 }
   0x4   :  { %1700 = vmatprep.subr.msk.bf16.mxu0 %vm1862_vm1, %v1698_v5  ;;  %v1747_v11 = vpack.c.bf16 %v217_v7, %v216_v6  ;;  %v1710_v18 = vpack.c.bf16 %v27_v16, %v26_v15  ;;  %v220_v19 = vmul.f32 %v26_v15, %v26_v15  ;;  %v221_v20 = vmul.f32 %v27_v16, %v27_v16  ;;  %v29_v22 = vld [vmem:[%s2620_s1 + $0x38] sm:$0xff]  ;;  %v30_v27 = vld [vmem:[%s2620_s1 + $0x40] sm:$0xff]  ;;  %v31_v28 = vld [vmem:[%s2620_s1 + $0x48] sm:$0xff] }
   0x5   :  { %1703 = vmatpush3.bf16.xpose.msk.msra.mxu0 %vm1862_vm1, %v1698_v5  ;;  %v1751_v17 = vpack.c.bf16 %v219_v13, %v218_v12  ;;  %v1716_v24 = vpack.c.bf16 %v29_v22, %v28_v21  ;;  %v222_v25 = vmul.f32 %v28_v21, %v28_v21  ;;  %v223_v26 = vmul.f32 %v29_v22, %v29_v22  ;;  %v32_v33 = vld [vmem:[%s2620_s1 + $0x50] sm:$0xff]  ;;  %v33_v34 = vld [vmem:[%s2620_s1 + $0x58] sm:$0xff]  ;;  %v34_v39 = vld [vmem:[%s2620_s1 + $0x60] sm:$0xff] }
   0x6   :  { %1749 = vmatpush3.bf16.xpose.msk.msra.mxu1 %vm1862_vm1, %v1747_v11  ;;  %1706 = vmatprep.subr.msk.bf16.mxu0 %vm1862_vm1, %v1704_v10  ;;  %v1755_v23 = vpack.c.bf16 %v221_v20, %v220_v19  ;;  %v1722_v30 = vpack.c.bf16 %v31_v28, %v30_v27  ;;  %v224_v31 = vmul.f32 %v30_v27, %v30_v27  ;;  %v35_v40 = vld [vmem:[%s2620_s1 + $0x68] sm:$0xff]  ;;  %v36_v45 = vld [vmem:[%s2620_s1 + $0x70] sm:$0xff]  ;;  %v37_v46 = vld [vmem:[%s2620_s1 + $0x78] sm:$0xff]  ;;  %v363_v62 = vsub.s32 0, %v362_v61 }
   0x7   :  { %1750 = vmatprep.subr.bf16.mxu1 %v1830_v3  ;;  %v1759_v29 = vpack.c.bf16 %v223_v26, %v222_v25  ;;  %v225_v32 = vmul.f32 %v31_v28, %v31_v28  ;;  %v1728_v36 = vpack.c.bf16 %v33_v34, %v32_v33  ;;  %v226_v37 = vmul.f32 %v32_v33, %v32_v33  ;;  %v15_v52 = vld [vmem:[%s2621_s0 + $0x8] sm:$0xff]  ;;  %v16_v53 = vld [vmem:[%s2621_s0 + $0x10] sm:$0xff]  ;;  %v17_v55 = vld [vmem:[%s2621_s0 + $0x18] sm:$0xff] }
   0x8   :  { %v227_v38 = vmul.f32 %v33_v34, %v33_v34  ;;  %v1734_v42 = vpack.c.bf16 %v35_v40, %v34_v39  ;;  %v228_v43 = vmul.f32 %v34_v39, %v34_v39  ;;  %v229_v44 = vmul.f32 %v35_v40, %v35_v40  ;;  %v18_v56 = vld [vmem:[%s2621_s0 + $0x20] sm:$0xff]  ;;  %v19_v57 = vld [vmem:[%s2621_s0 + $0x28] sm:$0xff]  ;;  %v20_v58 = vld [vmem:[%s2621_s0 + $0x30] sm:$0xff] }
   0x9   :  { %v1763_v35 = vpack.c.bf16 %v225_v32, %v224_v31  ;;  %v1740_v48 = vpack.c.bf16 %v37_v46, %v36_v45  ;;  %v230_v49 = vmul.f32 %v36_v45, %v36_v45  ;;  %v231_v50 = vmul.f32 %v37_v46, %v37_v46  ;;  %v21_v59 = vld [vmem:[%s2621_s0 + $0x38] sm:$0xff] }
   0xa   :  { %v1767_v41 = vpack.c.bf16 %v227_v38, %v226_v37  ;;  %v1771_v47 = vpack.c.bf16 %v229_v44, %v228_v43  ;;  %v2022_v27 = vand.u32 127, %v361_v60 }
   0xb   :  { %v1775_v51 = vpack.c.bf16 %v231_v50, %v230_v49 }
   0xd   :  { %1709 = vmatpush3.bf16.xpose.msk.msra.mxu0 %vm1862_vm1, %v1704_v10 }
   0xe   :  { %1753 = vmatpush3.bf16.xpose.msk.msra.mxu1 %vm1862_vm1, %v1751_v17  ;;  %1712 = vmatprep.subr.msk.bf16.mxu0 %vm1862_vm1, %v1710_v18 }
   0xf   :  { %1754 = vmatprep.subr.bf16.mxu1 %v1830_v3 }
  0x15   :  { %1715 = vmatpush3.bf16.xpose.msk.msra.mxu0 %vm1862_vm1, %v1710_v18 }
  0x16   :  { %1757 = vmatpush3.bf16.xpose.msk.msra.mxu1 %vm1862_vm1, %v1755_v23  ;;  %1718 = vmatprep.subr.msk.bf16.mxu0 %vm1862_vm1, %v1716_v24 }
  0x17   :  { %1758 = vmatprep.subr.bf16.mxu1 %v1830_v3 }
  0x1d   :  { %1721 = vmatpush3.bf16.xpose.msk.msra.mxu0 %vm1862_vm1, %v1716_v24 }
  0x1e   :  { %1761 = vmatpush3.bf16.xpose.msk.msra.mxu1 %vm1862_vm1, %v1759_v29  ;;  %1724 = vmatprep.subr.msk.bf16.mxu0 %vm1862_vm1, %v1722_v30 }
  0x1f   :  { %1762 = vmatprep.subr.bf16.mxu1 %v1830_v3 }
  0x25   :  { %1727 = vmatpush3.bf16.xpose.msk.msra.mxu0 %vm1862_vm1, %v1722_v30 }
  0x26   :  { %1765 = vmatpush3.bf16.xpose.msk.msra.mxu1 %vm1862_vm1, %v1763_v35  ;;  %1730 = vmatprep.subr.msk.bf16.mxu0 %vm1862_vm1, %v1728_v36 }
  0x27   :  { %1766 = vmatprep.subr.bf16.mxu1 %v1830_v3 }
  0x2d   :  { %1733 = vmatpush3.bf16.xpose.msk.msra.mxu0 %vm1862_vm1, %v1728_v36 }
  0x2e   :  { %1769 = vmatpush3.bf16.xpose.msk.msra.mxu1 %vm1862_vm1, %v1767_v41  ;;  %1736 = vmatprep.subr.msk.bf16.mxu0 %vm1862_vm1, %v1734_v42 }
  0x2f   :  { %1770 = vmatprep.subr.bf16.mxu1 %v1830_v3 }
  0x35   :  { %1739 = vmatpush3.bf16.xpose.msk.msra.mxu0 %vm1862_vm1, %v1734_v42 }
  0x36   :  { %1773 = vmatpush3.bf16.xpose.msk.msra.mxu1 %vm1862_vm1, %v1771_v47  ;;  %1742 = vmatprep.subr.msk.bf16.mxu0 %vm1862_vm1, %v1740_v48 }
  0x37   :  { %1774 = vmatprep.subr.bf16.mxu1 %v1830_v3 }
  0x3d   :  { %1745 = vmatpush3.bf16.xpose.msk.msra.mxu0 %vm1862_vm1, %v1740_v48 }
  0x3e   :  { %1777 = vmatpush3.bf16.xpose.msk.msra.mxu1 %vm1862_vm1, %v1775_v51 }
  0x44   :  { %1608 = vmatmul.mubr.msk.f32.vlgmr.msra.gmra.mrb[0].mxu0 %vm38_vm0, %v15_v52 }
  0x45   :  { %1652 = vmatmul.mubr.msk.f32.vlgmr.msra.gmra.mrb[0].mxu1 %vm38_vm0, %v1833_v54  ;;  %1610 = vmatprep.mubr.msk.f32.mxu0 %vm38_vm0, %v16_v53 }
  0x48   :  { %1611 = vmatmul.mubr.msk.f32.gmra.mrb[2].mxu0 %vm38_vm0, %v17_v55 }
  0x49   :  { %1613 = vmatprep.mubr.msk.f32.mxu0 %vm38_vm0, %v18_v56 }
  0x4c   :  { %1614 = vmatmul.mubr.msk.f32.gmra.mrb[4].mxu0 %vm38_vm0, %v19_v57 }
  0x4d   :  { %1616 = vmatprep.mubr.msk.f32.mxu0 %vm38_vm0, %v20_v58 }
  0x50   :  { %1617 = vmatmul.mubr.msk.f32.gmra.mrb[6].mxu0 %vm38_vm0, %v21_v59 }
 0x117   :  { %v1609_v63 = vpop.f32.mrb[0].mxu0 }
 0x118   :  { %v354_v0 = vmul.f32 2.0, %v1609_v63  ;;  %v177_v1 = vpop.f32.mrb[1].mxu0  ;;  %v349_v2 = vpop.f32.mrb[0].mxu1 }
 0x119   :  { %v353_v3 = vmul.f32 2.0, %v177_v1  ;;  %v364_v5 = vrot.slane %v349_v2, %v363_v62  ;;  %v1653_v6 = vpop.f32.mrb[1].mxu1 }
 0x11b   :  { %v1612_v7 = vpop.f32.mrb[2].mxu0  ;;  %v1998_v8 = vsub.f32 %v364_v5, %v354_v0  ;;  %v2000_v9 = vsub.f32 %v364_v5, %v353_v3 }
 0x11c   :  { %v356_v10 = vmul.f32 2.0, %v1612_v7  ;;  %v187_v11 = vpop.f32.mrb[3].mxu0 }
 0x11d   :  { %v355_v12 = vmul.f32 2.0, %v187_v11  ;;  %377 = vmin.xlane.f32.xlu1 %v1998_v8  ;;  %375 = vmin.xlane.f32.xlu0 %v2000_v9 }
 0x11e   :  { %v2004_v13 = vsub.f32 %v364_v5, %v356_v10 }
 0x11f   :  { %v2006_v14 = vsub.f32 %v364_v5, %v355_v12  ;;  %v1615_v15 = vpop.f32.mrb[4].mxu0 }
 0x120   :  { %v358_v16 = vmul.f32 2.0, %v1615_v15  ;;  %v197_v17 = vpop.f32.mrb[5].mxu0 }
 0x121   :  { %v357_v18 = vmul.f32 2.0, %v197_v17 }
 0x122   :  { %v2008_v19 = vsub.f32 %v364_v5, %v358_v16 }
 0x123   :  { %v2010_v20 = vsub.f32 %v364_v5, %v357_v18  ;;  %v1618_v21 = vpop.f32.mrb[6].mxu0 }
 0x124   :  { %v360_v22 = vmul.f32 2.0, %v1618_v21  ;;  %385 = vmin.xlane.f32.xlu1 %v2008_v19  ;;  %v207_v23 = vpop.f32.mrb[7].mxu0 }
 0x125   :  { %v359_v24 = vmul.f32 2.0, %v207_v23  ;;  %383 = vmin.xlane.f32.xlu0 %v2010_v20 }
 0x126   :  { %v2014_v25 = vsub.f32 %v364_v5, %v360_v22 }
 0x127   :  { %v2016_v26 = vsub.f32 %v364_v5, %v359_v24 }
 0x129   :  { %379 = vmin.xlane.f32.xlu0 %v2006_v14  ;;  %387 = vmin.xlane.f32.xlu1 %v2016_v26 }
 0x12d   :  { %381 = vmin.xlane.f32.xlu0 %v2004_v13  ;;  %389 = vmin.xlane.f32.xlu1 %v2014_v25 }
 0x1aa   :  { %v378_v28 = vpop.xlane.xlu1 %377  ;;  %v376_v29 = vpop.xlane.xlu0 %375 }
 0x1ab   :  { %vm392_vm3 = vcmp.eq.f32.partialorder %v1998_v8, %v378_v28  ;;  %vm391_vm4 = vcmp.eq.f32.partialorder %v2000_v9, %v376_v29 }
 0x1ac   :  { %v400_v30 = vsel %vm392_vm3, %v2022_v27, 128  ;;  %v399_v31 = vsel %vm391_vm4, %v2022_v27, 128 }
 0x1ad   :  { %v408_v32 = vshra.s32 %v399_v31, 16  ;;  %v422_v34 = vshra.s32 %v400_v30, 16  ;;  %v407_v60 = vand.u32 65535, %v399_v31  ;;  %v421_v63 = vand.u32 65535, %v400_v30 }
 0x1af   :  { %v410_v33 = vcvt.s32.f32 %v408_v32  ;;  %v424_v38 = vcvt.s32.f32 %v422_v34  ;;  %v409_v62 = vcvt.s32.f32 %v407_v60  ;;  %v423_v3 = vcvt.s32.f32 %v421_v63 }
 0x1b1   :  { %v386_v35 = vpop.xlane.xlu1 %385  ;;  %411 = vmin.xlane.f32.xlu0 %v410_v33 }
 0x1b2   :  { %vm396_vm5 = vcmp.eq.f32.partialorder %v2008_v19, %v386_v35  ;;  %v384_v36 = vpop.xlane.xlu0 %383 }
 0x1b3   :  { %v404_v37 = vsel %vm396_vm5, %v2022_v27, 128  ;;  %vm395_vm6 = vcmp.eq.f32.partialorder %v2010_v20, %v384_v36 }
 0x1b4   :  { %v403_v39 = vsel %vm395_vm6, %v2022_v27, 128  ;;  %v478_v40 = vshra.s32 %v404_v37, 16  ;;  %v477_v1 = vand.u32 65535, %v404_v37 }
 0x1b5   :  { %425 = vmin.xlane.f32.xlu0 %v424_v38  ;;  %v464_v44 = vshra.s32 %v403_v39, 16  ;;  %v463_v10 = vand.u32 65535, %v403_v39 }
 0x1b6   :  { %v380_v41 = vpop.xlane.xlu0 %379  ;;  %v388_v42 = vpop.xlane.xlu1 %387  ;;  %v480_v43 = vcvt.s32.f32 %v478_v40  ;;  %v479_v7 = vcvt.s32.f32 %v477_v1 }
 0x1b7   :  { %vm393_vm7 = vcmp.eq.f32.partialorder %v2006_v14, %v380_v41  ;;  %vm397_vm8 = vcmp.eq.f32.partialorder %v2016_v26, %v388_v42  ;;  %v466_v50 = vcvt.s32.f32 %v464_v44  ;;  %v465_v16 = vcvt.s32.f32 %v463_v10 }
 0x1b8   :  { %v401_v45 = vsel %vm393_vm7, %v2022_v27, 128  ;;  %v405_v46 = vsel %vm397_vm8, %v2022_v27, 128  ;;  %481 = vmin.xlane.f32.xlu1 %v480_v43 }
 0x1b9   :  { %v436_v47 = vshra.s32 %v401_v45, 16  ;;  %v492_v51 = vshra.s32 %v405_v46, 16  ;;  %v435_v11 = vand.u32 65535, %v401_v45  ;;  %v491_v17 = vand.u32 65535, %v405_v46 }
 0x1ba   :  { %v382_v48 = vpop.xlane.xlu0 %381  ;;  %v390_v49 = vpop.xlane.xlu1 %389 }
 0x1bb   :  { %vm394_vm9 = vcmp.eq.f32.partialorder %v2004_v13, %v382_v48  ;;  %vm398_vm10 = vcmp.eq.f32.partialorder %v2014_v25, %v390_v49  ;;  %v438_v52 = vcvt.s32.f32 %v436_v47  ;;  %v494_v56 = vcvt.s32.f32 %v492_v51 }
 0x1bc   :  { %v402_v53 = vsel %vm394_vm9, %v2022_v27, 128  ;;  %v406_v54 = vsel %vm398_vm10, %v2022_v27, 128  ;;  %467 = vmin.xlane.f32.xlu1 %v466_v50  ;;  %v437_v21 = vcvt.s32.f32 %v435_v11  ;;  %v493_v29 = vcvt.s32.f32 %v491_v17 }
 0x1bd   :  { %439 = vmin.xlane.f32.xlu0 %v438_v52  ;;  %v450_v55 = vshra.s32 %v402_v53, 16  ;;  %v506_v57 = vshra.s32 %v406_v54, 16  ;;  %v449_v22 = vand.u32 65535, %v402_v53  ;;  %v505_v30 = vand.u32 65535, %v406_v54 }
 0x1bf   :  { %v452_v58 = vcvt.s32.f32 %v450_v55  ;;  %v508_v59 = vcvt.s32.f32 %v506_v57  ;;  %v451_v32 = vcvt.s32.f32 %v449_v22  ;;  %v507_v36 = vcvt.s32.f32 %v505_v30 }
 0x1c0   :  { %495 = vmin.xlane.f32.xlu1 %v494_v56 }
 0x1c1   :  { %453 = vmin.xlane.f32.xlu0 %v452_v58 }
 0x1c4   :  { %509 = vmin.xlane.f32.xlu1 %v508_v59 }
 0x23e   :  { %v412_v61 = vpop.xlane.xlu0 %411 }
 0x23f   :  { %vm413_vm11 = vcmp.eq.f32.partialorder %v410_v33, %v412_v61 }
 0x240   :  { %v414_v0 = vsel %vm413_vm11, %v409_v62, inf }
 0x241   :  { %415 = vmin.xlane.f32.xlu0 %v414_v0 }
 0x242   :  { %v426_v2 = vpop.xlane.xlu0 %425 }
 0x243   :  { %vm427_vm12 = vcmp.eq.f32.partialorder %v424_v38, %v426_v2  ;;  %v418_v38 = vcvt.f32.s32 %v412_v61  ;;  %v432_v41 = vcvt.f32.s32 %v426_v2 }
 0x244   :  { %v428_v5 = vsel %vm427_vm12, %v423_v3, inf }
 0x245   :  { %429 = vmin.xlane.f32.xlu0 %v428_v5  ;;  %v482_v6 = vpop.xlane.xlu1 %481  ;;  %v419_v40 = vshll.u32 %v418_v38, 16  ;;  %v433_v46 = vshll.u32 %v432_v41, 16 }
 0x246   :  { %vm483_vm13 = vcmp.eq.f32.partialorder %v480_v43, %v482_v6  ;;  %v488_v44 = vcvt.f32.s32 %v482_v6 }
 0x247   :  { %v484_v12 = vsel %vm483_vm13, %v479_v7, inf }
 0x248   :  { %485 = vmin.xlane.f32.xlu1 %v484_v12  ;;  %v489_v51 = vshll.u32 %v488_v44, 16 }
 0x249   :  { %v468_v15 = vpop.xlane.xlu1 %467 }
 0x24a   :  { %v440_v18 = vpop.xlane.xlu0 %439  ;;  %vm469_vm14 = vcmp.eq.f32.partialorder %v466_v50, %v468_v15 }
 0x24b   :  { %v470_v23 = vsel %vm469_vm14, %v465_v16, inf  ;;  %vm441_vm15 = vcmp.eq.f32.partialorder %v438_v52, %v440_v18  ;;  %v474_v52 = vcvt.f32.s32 %v468_v15  ;;  %v446_v54 = vcvt.f32.s32 %v440_v18 }
 0x24c   :  { %471 = vmin.xlane.f32.xlu1 %v470_v23  ;;  %v442_v24 = vsel %vm441_vm15, %v437_v21, inf }
 0x24d   :  { %443 = vmin.xlane.f32.xlu0 %v442_v24  ;;  %v496_v28 = vpop.xlane.xlu1 %495  ;;  %v475_v57 = vshll.u32 %v474_v52, 16  ;;  %v447_v61 = vshll.u32 %v446_v54, 16 }
 0x24e   :  { %v454_v31 = vpop.xlane.xlu0 %453  ;;  %vm497_vm0 = vcmp.eq.f32.partialorder %v494_v56, %v496_v28 }
 0x24f   :  { %v498_v33 = vsel %vm497_vm0, %v493_v29, inf  ;;  %vm455_vm1 = vcmp.eq.f32.partialorder %v452_v58, %v454_v31  ;;  %v502_v58 = vcvt.f32.s32 %v496_v28  ;;  %v460_v62 = vcvt.f32.s32 %v454_v31 }
 0x250   :  { %499 = vmin.xlane.f32.xlu1 %v498_v33  ;;  %v456_v34 = vsel %vm455_vm1, %v451_v32, inf }
 0x251   :  { %457 = vmin.xlane.f32.xlu0 %v456_v34  ;;  %v510_v35 = vpop.xlane.xlu1 %509  ;;  %v503_v3 = vshll.u32 %v502_v58, 16  ;;  %v461_v10 = vshll.u32 %v460_v62, 16 }
 0x252   :  { %vm511_vm2 = vcmp.eq.f32.partialorder %v508_v59, %v510_v35  ;;  %v516_v5 = vcvt.f32.s32 %v510_v35 }
 0x253   :  { %v512_v37 = vsel %vm511_vm2, %v507_v36, inf }
 0x254   :  { %513 = vmin.xlane.f32.xlu1 %v512_v37 }
 0x2ce   :  { %v416_v39 = vpop.xlane.xlu0 %415 }
 0x2cf   :  { %v417_v42 = vcvt.f32.s32 %v416_v39 }
 0x2d1   :  { %v2040_v43 = vadd.s32 %v419_v40, %v417_v42 }
 0x2d2   :  { %v430_v45 = vpop.xlane.xlu0 %429 }
 0x2d3   :  { %v431_v47 = vcvt.f32.s32 %v430_v45  ;;  %vm519_vm3 = vcmp.eq.s32.totalorder %v2022_v27, %v2040_v43 }
 0x2d4   :  { %v2048_v48 = vsel %vm519_vm3, inf, %v2000_v9 }
 0x2d5   :  { %v2050_v49 = vadd.s32 %v433_v46, %v431_v47  ;;  %559 = vmin.xlane.f32.xlu0 %v2048_v48  ;;  %v486_v50 = vpop.xlane.xlu1 %485 }
 0x2d6   :  { %v487_v53 = vcvt.f32.s32 %v486_v50 }
 0x2d7   :  { %vm520_vm4 = vcmp.eq.s32.totalorder %v2022_v27, %v2050_v49 }
 0x2d8   :  { %v2055_v55 = vadd.s32 %v489_v51, %v487_v53  ;;  %v2061_v9 = vsel %vm520_vm4, inf, %v1998_v8  ;;  %v1471_v43 = vsel %vm520_vm4, 1.0, %v1832_v4 }
 0x2d9   :  { %561 = vmin.xlane.f32.xlu0 %v2061_v9  ;;  %v472_v56 = vpop.xlane.xlu1 %471 }
 0x2da   :  { %v473_v59 = vcvt.f32.s32 %v472_v56  ;;  %v444_v60 = vpop.xlane.xlu0 %443  ;;  %vm524_vm5 = vcmp.eq.s32.totalorder %v2022_v27, %v2055_v55 }
 0x2db   :  { %v445_v63 = vcvt.f32.s32 %v444_v60  ;;  %v2070_v0 = vsel %vm524_vm5, inf, %v2008_v19 }
 0x2dc   :  { %v2072_v8 = vadd.s32 %v475_v57, %v473_v59  ;;  %569 = vmin.xlane.f32.xlu1 %v2070_v0 }
 0x2dd   :  { %v2075_v1 = vadd.s32 %v447_v61, %v445_v63  ;;  %v500_v2 = vpop.xlane.xlu1 %499 }
 0x2de   :  { %v501_v6 = vcvt.f32.s32 %v500_v2  ;;  %v458_v7 = vpop.xlane.xlu0 %457  ;;  %vm523_vm6 = vcmp.eq.s32.totalorder %v2022_v27, %v2072_v8 }
 0x2df   :  { %v459_v11 = vcvt.f32.s32 %v458_v7  ;;  %v2083_v19 = vsel %vm523_vm6, inf, %v2010_v20  ;;  %vm521_vm7 = vcmp.eq.s32.totalorder %v2022_v27, %v2075_v1  ;;  %v517_v20 = vshll.u32 %v516_v5, 16 }
 0x2e0   :  { %v2087_v12 = vadd.s32 %v503_v3, %v501_v6  ;;  %567 = vmin.xlane.f32.xlu1 %v2083_v19  ;;  %v2094_v15 = vsel %vm521_vm7, inf, %v2006_v14 }
 0x2e1   :  { %v2096_v16 = vadd.s32 %v461_v10, %v459_v11  ;;  %563 = vmin.xlane.f32.xlu0 %v2094_v15  ;;  %v514_v17 = vpop.xlane.xlu1 %513 }
 0x2e2   :  { %v515_v18 = vcvt.f32.s32 %v514_v17  ;;  %vm525_vm8 = vcmp.eq.s32.totalorder %v2022_v27, %v2087_v12 }
 0x2e3   :  { %v2105_v21 = vsel %vm525_vm8, inf, %v2016_v26  ;;  %vm522_vm9 = vcmp.eq.s32.totalorder %v2022_v27, %v2096_v16 }
 0x2e4   :  { %v2109_v14 = vadd.s32 %v517_v20, %v515_v18  ;;  %571 = vmin.xlane.f32.xlu1 %v2105_v21  ;;  %v2116_v22 = vsel %vm522_vm9, inf, %v2004_v13 }
 0x2e5   :  { %565 = vmin.xlane.f32.xlu0 %v2116_v22 }
 0x2e6   :  { %vm526_vm10 = vcmp.eq.s32.totalorder %v2022_v27, %v2109_v14 }
 0x2e7   :  { %v2125_v26 = vsel %vm526_vm10, inf, %v2014_v25 }
 0x2e8   :  { %573 = vmin.xlane.f32.xlu1 %v2125_v26 }
 0x362   :  { %v560_v23 = vpop.xlane.xlu0 %559 }
 0x363   :  { %vm575_vm11 = vcmp.eq.f32.partialorder %v2048_v48, %v560_v23 }
 0x364   :  { %v583_v24 = vsel %vm575_vm11, %v2022_v27, 128 }
 0x365   :  { %v592_v13 = vshra.s32 %v583_v24, 16  ;;  %v591_v60 = vand.u32 65535, %v583_v24 }
 0x366   :  { %v562_v28 = vpop.xlane.xlu0 %561 }
 0x367   :  { %vm576_vm12 = vcmp.eq.f32.partialorder %v2061_v9, %v562_v28  ;;  %v594_v29 = vcvt.s32.f32 %v592_v13  ;;  %v593_v63 = vcvt.s32.f32 %v591_v60 }
 0x368   :  { %v584_v30 = vsel %vm576_vm12, %v2022_v27, 128 }
 0x369   :  { %595 = vmin.xlane.f32.xlu0 %v594_v29  ;;  %v570_v31 = vpop.xlane.xlu1 %569  ;;  %v606_v32 = vshra.s32 %v584_v30, 16  ;;  %v605_v61 = vand.u32 65535, %v584_v30 }
 0x36a   :  { %vm580_vm13 = vcmp.eq.f32.partialorder %v2070_v0, %v570_v31 }
 0x36b   :  { %v588_v25 = vsel %vm580_vm13, %v2022_v27, 128  ;;  %v608_v33 = vcvt.s32.f32 %v606_v32  ;;  %v607_v6 = vcvt.s32.f32 %v605_v61 }
 0x36c   :  { %v662_v34 = vshra.s32 %v588_v25, 16  ;;  %v661_v3 = vand.u32 65535, %v588_v25 }
 0x36d   :  { %609 = vmin.xlane.f32.xlu0 %v608_v33  ;;  %v568_v35 = vpop.xlane.xlu1 %567 }
 0x36e   :  { %vm579_vm14 = vcmp.eq.f32.partialorder %v2083_v19, %v568_v35  ;;  %v564_v36 = vpop.xlane.xlu0 %563  ;;  %v664_v37 = vcvt.s32.f32 %v662_v34  ;;  %v663_v17 = vcvt.s32.f32 %v661_v3 }
 0x36f   :  { %v587_v38 = vsel %vm579_vm14, %v2022_v27, 128  ;;  %vm577_vm15 = vcmp.eq.f32.partialorder %v2094_v15, %v564_v36 }
 0x370   :  { %v585_v39 = vsel %vm577_vm15, %v2022_v27, 128  ;;  %665 = vmin.xlane.f32.xlu1 %v664_v37  ;;  %v648_v40 = vshra.s32 %v587_v38, 16  ;;  %v647_v10 = vand.u32 65535, %v587_v38 }
 0x371   :  { %v572_v41 = vpop.xlane.xlu1 %571  ;;  %v620_v42 = vshra.s32 %v585_v39, 16  ;;  %v619_v20 = vand.u32 65535, %v585_v39 }
 0x372   :  { %vm581_vm0 = vcmp.eq.f32.partialorder %v2105_v21, %v572_v41  ;;  %v566_v44 = vpop.xlane.xlu0 %565  ;;  %v650_v45 = vcvt.s32.f32 %v648_v40  ;;  %v649_v13 = vcvt.s32.f32 %v647_v10 }
 0x373   :  { %v589_v46 = vsel %vm581_vm0, %v2022_v27, 128  ;;  %vm578_vm1 = vcmp.eq.f32.partialorder %v2116_v22, %v566_v44  ;;  %v622_v47 = vcvt.s32.f32 %v620_v42  ;;  %v621_v30 = vcvt.s32.f32 %v619_v20 }
 0x374   :  { %v586_v50 = vsel %vm578_vm1, %v2022_v27, 128  ;;  %651 = vmin.xlane.f32.xlu1 %v650_v45  ;;  %v676_v51 = vshra.s32 %v589_v46, 16  ;;  %v675_v23 = vand.u32 65535, %v589_v46 }
 0x375   :  { %623 = vmin.xlane.f32.xlu0 %v622_v47  ;;  %v574_v52 = vpop.xlane.xlu1 %573  ;;  %v634_v53 = vshra.s32 %v586_v50, 16  ;;  %v633_v28 = vand.u32 65535, %v586_v50 }
 0x376   :  { %vm582_vm2 = vcmp.eq.f32.partialorder %v2125_v26, %v574_v52  ;;  %v678_v54 = vcvt.s32.f32 %v676_v51  ;;  %v677_v34 = vcvt.s32.f32 %v675_v23 }
 0x377   :  { %v590_v56 = vsel %vm582_vm2, %v2022_v27, 128  ;;  %v636_v57 = vcvt.s32.f32 %v634_v53  ;;  %v635_v36 = vcvt.s32.f32 %v633_v28 }
 0x378   :  { %679 = vmin.xlane.f32.xlu1 %v678_v54  ;;  %v690_v58 = vshra.s32 %v590_v56, 16  ;;  %v689_v25 = vand.u32 65535, %v590_v56  ;;  %v1470_v56 = vsel %vm519_vm3, 1.0, %v1832_v4 }
 0x379   :  { %637 = vmin.xlane.f32.xlu0 %v636_v57 }
 0x37a   :  { %v692_v59 = vcvt.s32.f32 %v690_v58  ;;  %v691_v40 = vcvt.s32.f32 %v689_v25 }
 0x37c   :  { %693 = vmin.xlane.f32.xlu1 %v692_v59 }
 0x3f6   :  { %v596_v62 = vpop.xlane.xlu0 %595 }
 0x3f7   :  { %vm597_vm11 = vcmp.eq.f32.partialorder %v594_v29, %v596_v62  ;;  %v602_v42 = vcvt.f32.s32 %v596_v62 }
 0x3f8   :  { %v598_v2 = vsel %vm597_vm11, %v593_v63, inf }
 0x3f9   :  { %599 = vmin.xlane.f32.xlu0 %v598_v2 }
 0x3fa   :  { %v610_v5 = vpop.xlane.xlu0 %609 }
 0x3fb   :  { %vm611_vm12 = vcmp.eq.f32.partialorder %v608_v33, %v610_v5  ;;  %v616_v46 = vcvt.f32.s32 %v610_v5 }
 0x3fc   :  { %v612_v7 = vsel %vm611_vm12, %v607_v6, inf }
 0x3fd   :  { %613 = vmin.xlane.f32.xlu0 %v612_v7  ;;  %v666_v11 = vpop.xlane.xlu1 %665  ;;  %v617_v53 = vshll.u32 %v616_v46, 16  ;;  %v1475_v7 = vsel %vm524_vm5, 1.0, %v1832_v4 }
 0x3fe   :  { %vm667_vm13 = vcmp.eq.f32.partialorder %v664_v37, %v666_v11  ;;  %v672_v51 = vcvt.f32.s32 %v666_v11 }
 0x3ff   :  { %v668_v18 = vsel %vm667_vm13, %v663_v17, inf }
 0x400   :  { %669 = vmin.xlane.f32.xlu1 %v668_v18  ;;  %v673_v62 = vshll.u32 %v672_v51, 16 }
 0x401   :  { %v652_v24 = vpop.xlane.xlu1 %651 }
 0x402   :  { %v624_v29 = vpop.xlane.xlu0 %623  ;;  %vm653_vm14 = vcmp.eq.f32.partialorder %v650_v45, %v652_v24  ;;  %v603_v45 = vshll.u32 %v602_v42, 16  ;;  %v658_v63 = vcvt.f32.s32 %v652_v24 }
 0x403   :  { %v654_v31 = vsel %vm653_vm14, %v649_v13, inf  ;;  %vm625_vm15 = vcmp.eq.f32.partialorder %v622_v47, %v624_v29  ;;  %v630_v3 = vcvt.f32.s32 %v624_v29 }
 0x404   :  { %655 = vmin.xlane.f32.xlu1 %v654_v31  ;;  %v626_v32 = vsel %vm625_vm15, %v621_v30, inf  ;;  %v659_v20 = vshll.u32 %v658_v63, 16  ;;  %v1474_v30 = vsel %vm523_vm6, 1.0, %v1832_v4  ;;  %v1472_v31 = vsel %vm521_vm7, 1.0, %v1832_v4 }
 0x405   :  { %627 = vmin.xlane.f32.xlu0 %v626_v32  ;;  %v680_v33 = vpop.xlane.xlu1 %679 }
 0x406   :  { %v638_v35 = vpop.xlane.xlu0 %637  ;;  %vm681_vm0 = vcmp.eq.f32.partialorder %v678_v54, %v680_v33  ;;  %v686_v10 = vcvt.f32.s32 %v680_v33 }
 0x407   :  { %v682_v37 = vsel %vm681_vm0, %v677_v34, inf  ;;  %vm639_vm1 = vcmp.eq.f32.partialorder %v636_v57, %v638_v35  ;;  %v644_v49 = vcvt.f32.s32 %v638_v35 }
 0x408   :  { %683 = vmin.xlane.f32.xlu1 %v682_v37  ;;  %v640_v38 = vsel %vm639_vm1, %v635_v36, inf  ;;  %v687_v32 = vshll.u32 %v686_v10, 16 }
 0x409   :  { %641 = vmin.xlane.f32.xlu0 %v640_v38  ;;  %v2144_v39 = vpop.xlane.xlu1 %693  ;;  %v645_v33 = vshll.u32 %v644_v49, 16 }
 0x40a   :  { %vm695_vm2 = vcmp.eq.f32.partialorder %v692_v59, %v2144_v39  ;;  %v700_v34 = vcvt.f32.s32 %v2144_v39 }
 0x40b   :  { %v696_v41 = vsel %vm695_vm2, %v691_v40, inf }
 0x40c   :  { %697 = vmin.xlane.f32.xlu1 %v696_v41  ;;  %v701_v46 = vshll.u32 %v700_v34, 16 }
 0x486   :  { %v600_v44 = vpop.xlane.xlu0 %599 }
 0x487   :  { %v601_v47 = vcvt.f32.s32 %v600_v44 }
 0x489   :  { %v604_v50 = vadd.s32 %v603_v45, %v601_v47  ;;  %v1476_v45 = vsel %vm525_vm8, 1.0, %v1832_v4 }
 0x48a   :  { %v614_v52 = vpop.xlane.xlu0 %613 }
 0x48b   :  { %v615_v54 = vcvt.f32.s32 %v614_v52  ;;  %vm703_vm11 = vcmp.eq.s32.totalorder %v2022_v27, %v604_v50 }
 0x48c   :  { %v2153_v57 = vsel %vm703_vm11, inf, %v2048_v48  ;;  %v1478_v58 = vsel %vm703_vm11, 1.0, %v1832_v4 }
 0x48d   :  { %v618_v59 = vadd.s32 %v617_v53, %v615_v54  ;;  %743 = vmin.xlane.f32.xlu0 %v2153_v57  ;;  %v2157_v60 = vadd.f32 %v1478_v58, %v1470_v56  ;;  %v670_v61 = vpop.xlane.xlu1 %669 }
 0x48e   :  { %v671_v2 = vcvt.f32.s32 %v670_v61 }
 0x48f   :  { %vm704_vm12 = vcmp.eq.s32.totalorder %v2022_v27, %v618_v59 }
 0x490   :  { %v674_v48 = vadd.s32 %v673_v62, %v671_v2  ;;  %v2165_v5 = vsel %vm704_vm12, inf, %v2061_v9  ;;  %v1479_v6 = vsel %vm704_vm12, 1.0, %v1832_v4  ;;  %v631_v9 = vshll.u32 %v630_v3, 16 }
 0x491   :  { %745 = vmin.xlane.f32.xlu0 %v2165_v5  ;;  %v2173_v11 = vadd.f32 %v1479_v6, %v1471_v43  ;;  %v656_v17 = vpop.xlane.xlu1 %655 }
 0x492   :  { %v657_v18 = vcvt.f32.s32 %v656_v17  ;;  %v628_v23 = vpop.xlane.xlu0 %627  ;;  %vm708_vm3 = vcmp.eq.s32.totalorder %v2022_v27, %v674_v48 }
 0x493   :  { %v629_v24 = vcvt.f32.s32 %v628_v23  ;;  %v2177_v13 = vsel %vm708_vm3, inf, %v2070_v0  ;;  %v1483_v55 = vsel %vm708_vm3, 1.0, %v1832_v4 }
 0x494   :  { %v660_v28 = vadd.s32 %v659_v20, %v657_v18  ;;  %753 = vmin.xlane.f32.xlu1 %v2177_v13  ;;  %v2181_v29 = vadd.f32 %v1483_v55, %v1475_v7 }
 0x495   :  { %v632_v0 = vadd.s32 %v631_v9, %v629_v24  ;;  %v684_v25 = vpop.xlane.xlu1 %683 }
 0x496   :  { %v685_v35 = vcvt.f32.s32 %v684_v25  ;;  %v642_v36 = vpop.xlane.xlu0 %641  ;;  %vm707_vm4 = vcmp.eq.s32.totalorder %v2022_v27, %v660_v28 }
 0x497   :  { %v643_v37 = vcvt.f32.s32 %v642_v36  ;;  %v2194_v38 = vsel %vm707_vm4, inf, %v2083_v19  ;;  %v1482_v8 = vsel %vm707_vm4, 1.0, %v1832_v4  ;;  %vm705_vm5 = vcmp.eq.s32.totalorder %v2022_v27, %v632_v0 }
 0x498   :  { %v688_v1 = vadd.s32 %v687_v32, %v685_v35  ;;  %751 = vmin.xlane.f32.xlu1 %v2194_v38  ;;  %v2199_v40 = vadd.f32 %v1482_v8, %v1474_v30  ;;  %v2202_v41 = vsel %vm705_vm5, inf, %v2094_v15  ;;  %v1480_v39 = vsel %vm705_vm5, 1.0, %v1832_v4 }
 0x499   :  { %v646_v42 = vadd.s32 %v645_v33, %v643_v37  ;;  %747 = vmin.xlane.f32.xlu0 %v2202_v41  ;;  %v2206_v44 = vadd.f32 %v1480_v39, %v1472_v31  ;;  %v698_v19 = vpop.xlane.xlu1 %697  ;;  %v1473_v15 = vsel %vm522_vm9, 1.0, %v1832_v4 }
 0x49a   :  { %v699_v47 = vcvt.f32.s32 %v698_v19  ;;  %vm709_vm6 = vcmp.eq.s32.totalorder %v2022_v27, %v688_v1 }
 0x49b   :  { %v2218_v50 = vsel %vm709_vm6, inf, %v2105_v21  ;;  %v1484_v51 = vsel %vm709_vm6, 1.0, %v1832_v4  ;;  %vm706_vm7 = vcmp.eq.s32.totalorder %v2022_v27, %v646_v42  ;;  %v1477_v21 = vsel %vm526_vm10, 1.0, %v1832_v4 }
 0x49c   :  { %v702_v52 = vadd.s32 %v701_v46, %v699_v47  ;;  %755 = vmin.xlane.f32.xlu1 %v2218_v50  ;;  %v2223_v12 = vadd.f32 %v1484_v51, %v1476_v45  ;;  %v2226_v53 = vsel %vm706_vm7, inf, %v2116_v22  ;;  %v1481_v54 = vsel %vm706_vm7, 1.0, %v1832_v4 }
 0x49d   :  { %749 = vmin.xlane.f32.xlu0 %v2226_v53  ;;  %v2230_v16 = vadd.f32 %v1481_v54, %v1473_v15 }
 0x49e   :  { %vm710_vm8 = vcmp.eq.s32.totalorder %v2022_v27, %v702_v52 }
 0x49f   :  { %v2238_v56 = vsel %vm710_vm8, inf, %v2125_v26  ;;  %v1485_v58 = vsel %vm710_vm8, 1.0, %v1832_v4 }
 0x4a0   :  { %757 = vmin.xlane.f32.xlu1 %v2238_v56  ;;  %v2242_v22 = vadd.f32 %v1485_v58, %v1477_v21 }
 0x51a   :  { %v744_v59 = vpop.xlane.xlu0 %743 }
 0x51b   :  { %vm759_vm9 = vcmp.eq.f32.partialorder %v2153_v57, %v744_v59 }
 0x51c   :  { %v767_v61 = vsel %vm759_vm9, %v2022_v27, 128 }
 0x51d   :  { %v776_v62 = vshra.s32 %v767_v61, 16  ;;  %v775_v8 = vand.u32 65535, %v767_v61 }
 0x51e   :  { %v746_v63 = vpop.xlane.xlu0 %745 }
 0x51f   :  { %vm760_vm13 = vcmp.eq.f32.partialorder %v2165_v5, %v746_v63  ;;  %v778_v14 = vcvt.s32.f32 %v776_v62  ;;  %v777_v42 = vcvt.s32.f32 %v775_v8 }
 0x520   :  { %v768_v2 = vsel %vm760_vm13, %v2022_v27, 128 }
 0x521   :  { %779 = vmin.xlane.f32.xlu0 %v778_v14  ;;  %v754_v26 = vpop.xlane.xlu1 %753  ;;  %v790_v3 = vshra.s32 %v768_v2, 16  ;;  %v789_v1 = vand.u32 65535, %v768_v2 }
 0x522   :  { %vm764_vm10 = vcmp.eq.f32.partialorder %v2177_v13, %v754_v26 }
 0x523   :  { %v772_v43 = vsel %vm764_vm10, %v2022_v27, 128  ;;  %v792_v48 = vcvt.s32.f32 %v790_v3  ;;  %v791_v47 = vcvt.s32.f32 %v789_v1 }
 0x524   :  { %v846_v6 = vshra.s32 %v772_v43, 16  ;;  %v845_v45 = vand.u32 65535, %v772_v43 }
 0x525   :  { %793 = vmin.xlane.f32.xlu0 %v792_v48  ;;  %v752_v7 = vpop.xlane.xlu1 %751 }
 0x526   :  { %vm763_vm14 = vcmp.eq.f32.partialorder %v2194_v38, %v752_v7  ;;  %v748_v10 = vpop.xlane.xlu0 %747  ;;  %v848_v17 = vcvt.s32.f32 %v846_v6  ;;  %v847_v54 = vcvt.s32.f32 %v845_v45 }
 0x527   :  { %v771_v20 = vsel %vm763_vm14, %v2022_v27, 128  ;;  %vm761_vm15 = vcmp.eq.f32.partialorder %v2202_v41, %v748_v10 }
 0x528   :  { %v769_v49 = vsel %vm761_vm15, %v2022_v27, 128  ;;  %849 = vmin.xlane.f32.xlu1 %v848_v17  ;;  %v832_v18 = vshra.s32 %v771_v20, 16  ;;  %v831_v51 = vand.u32 65535, %v771_v20 }
 0x529   :  { %v756_v23 = vpop.xlane.xlu1 %755  ;;  %v804_v9 = vshra.s32 %v769_v49, 16  ;;  %v803_v21 = vand.u32 65535, %v769_v49 }
 0x52a   :  { %vm765_vm0 = vcmp.eq.f32.partialorder %v2218_v50, %v756_v23  ;;  %v750_v24 = vpop.xlane.xlu0 %749  ;;  %v834_v55 = vcvt.s32.f32 %v832_v18  ;;  %v833_v62 = vcvt.s32.f32 %v831_v51 }
 0x52b   :  { %v773_v28 = vsel %vm765_vm0, %v2022_v27, 128  ;;  %vm762_vm1 = vcmp.eq.f32.partialorder %v2226_v53, %v750_v24  ;;  %v806_v30 = vcvt.s32.f32 %v804_v9  ;;  %v805_v2 = vcvt.s32.f32 %v803_v21 }
 0x52c   :  { %v770_v31 = vsel %vm762_vm1, %v2022_v27, 128  ;;  %835 = vmin.xlane.f32.xlu1 %v834_v55  ;;  %v860_v32 = vshra.s32 %v773_v28, 16  ;;  %v859_v59 = vand.u32 65535, %v773_v28 }
 0x52d   :  { %807 = vmin.xlane.f32.xlu0 %v806_v30  ;;  %v758_v0 = vpop.xlane.xlu1 %757  ;;  %v818_v25 = vshra.s32 %v770_v31, 16  ;;  %v817_v63 = vand.u32 65535, %v770_v31 }
 0x52e   :  { %vm766_vm2 = vcmp.eq.f32.partialorder %v2238_v56, %v758_v0  ;;  %v862_v33 = vcvt.s32.f32 %v860_v32  ;;  %v861_v6 = vcvt.s32.f32 %v859_v59 }
 0x52f   :  { %v774_v34 = vsel %vm766_vm2, %v2022_v27, 128  ;;  %v820_v35 = vcvt.s32.f32 %v818_v25  ;;  %v819_v10 = vcvt.s32.f32 %v817_v63 }
 0x530   :  { %863 = vmin.xlane.f32.xlu1 %v862_v33  ;;  %v874_v36 = vshra.s32 %v774_v34, 16  ;;  %v873_v43 = vand.u32 65535, %v774_v34 }
 0x531   :  { %821 = vmin.xlane.f32.xlu0 %v820_v35 }
 0x532   :  { %v876_v37 = vcvt.s32.f32 %v874_v36  ;;  %v875_v18 = vcvt.s32.f32 %v873_v43 }
 0x534   :  { %877 = vmin.xlane.f32.xlu1 %v876_v37 }
 0x5ae   :  { %v780_v39 = vpop.xlane.xlu0 %779 }
 0x5af   :  { %vm781_vm11 = vcmp.eq.f32.partialorder %v778_v14, %v780_v39  ;;  %v786_v9 = vcvt.f32.s32 %v780_v39 }
 0x5b0   :  { %v782_v19 = vsel %vm781_vm11, %v777_v42, inf }
 0x5b1   :  { %783 = vmin.xlane.f32.xlu0 %v782_v19 }
 0x5b2   :  { %v794_v46 = vpop.xlane.xlu0 %793 }
 0x5b3   :  { %vm795_vm12 = vcmp.eq.f32.partialorder %v792_v48, %v794_v46  ;;  %v800_v28 = vcvt.f32.s32 %v794_v46 }
 0x5b4   :  { %v796_v15 = vsel %vm795_vm12, %v791_v47, inf }
 0x5b5   :  { %797 = vmin.xlane.f32.xlu0 %v796_v15  ;;  %v850_v52 = vpop.xlane.xlu1 %849  ;;  %v801_v25 = vshll.u32 %v800_v28, 16 }
 0x5b6   :  { %vm851_vm3 = vcmp.eq.f32.partialorder %v848_v17, %v850_v52  ;;  %v856_v32 = vcvt.f32.s32 %v850_v52 }
 0x5b7   :  { %v852_v58 = vsel %vm851_vm3, %v847_v54, inf }
 0x5b8   :  { %853 = vmin.xlane.f32.xlu1 %v852_v58  ;;  %v857_v1 = vshll.u32 %v856_v32, 16 }
 0x5b9   :  { %v836_v61 = vpop.xlane.xlu1 %835 }
 0x5ba   :  { %v808_v14 = vpop.xlane.xlu0 %807  ;;  %vm837_vm4 = vcmp.eq.f32.partialorder %v834_v55, %v836_v61  ;;  %v787_v55 = vshll.u32 %v786_v9, 16  ;;  %v842_v39 = vcvt.f32.s32 %v836_v61 }
 0x5bb   :  { %v838_v26 = vsel %vm837_vm4, %v833_v62, inf  ;;  %vm809_vm5 = vcmp.eq.f32.partialorder %v806_v30, %v808_v14  ;;  %v814_v19 = vcvt.f32.s32 %v808_v14 }
 0x5bc   :  { %839 = vmin.xlane.f32.xlu1 %v838_v26  ;;  %v810_v3 = vsel %vm809_vm5, %v805_v2, inf  ;;  %v843_v51 = vshll.u32 %v842_v39, 16 }
 0x5bd   :  { %811 = vmin.xlane.f32.xlu0 %v810_v3  ;;  %v864_v48 = vpop.xlane.xlu1 %863  ;;  %v815_v58 = vshll.u32 %v814_v19, 16 }
 0x5be   :  { %v822_v7 = vpop.xlane.xlu0 %821  ;;  %vm865_vm6 = vcmp.eq.f32.partialorder %v862_v33, %v864_v48  ;;  %v870_v47 = vcvt.f32.s32 %v864_v48 }
 0x5bf   :  { %v866_v17 = vsel %vm865_vm6, %v861_v6, inf  ;;  %vm823_vm7 = vcmp.eq.f32.partialorder %v820_v35, %v822_v7  ;;  %v828_v52 = vcvt.f32.s32 %v822_v7 }
 0x5c0   :  { %867 = vmin.xlane.f32.xlu1 %v866_v17  ;;  %v824_v20 = vsel %vm823_vm7, %v819_v10, inf  ;;  %v871_v63 = vshll.u32 %v870_v47, 16 }
 0x5c1   :  { %825 = vmin.xlane.f32.xlu0 %v824_v20  ;;  %v2260_v49 = vpop.xlane.xlu1 %877  ;;  %v829_v26 = vshll.u32 %v828_v52, 16 }
 0x5c2   :  { %vm879_vm8 = vcmp.eq.f32.partialorder %v876_v37, %v2260_v49  ;;  %v884_v3 = vcvt.f32.s32 %v2260_v49 }
 0x5c3   :  { %v880_v23 = vsel %vm879_vm8, %v875_v18, inf }
 0x5c4   :  { %881 = vmin.xlane.f32.xlu1 %v880_v23  ;;  %v885_v23 = vshll.u32 %v884_v3, 16 }
 0x63e   :  { %v784_v24 = vpop.xlane.xlu0 %783 }
 0x63f   :  { %v785_v30 = vcvt.f32.s32 %v784_v24 }
 0x641   :  { %v788_v31 = vadd.s32 %v787_v55, %v785_v30 }
 0x642   :  { %v798_v0 = vpop.xlane.xlu0 %797 }
 0x643   :  { %v799_v33 = vcvt.f32.s32 %v798_v0  ;;  %vm887_vm9 = vcmp.eq.s32.totalorder %v2022_v27, %v788_v31 }
 0x644   :  { %v2265_v34 = vsel %vm887_vm9, inf, %v2153_v57  ;;  %v1486_v35 = vsel %vm887_vm9, 1.0, %v1832_v4 }
 0x645   :  { %v802_v36 = vadd.s32 %v801_v25, %v799_v33  ;;  %927 = vmin.xlane.f32.xlu0 %v2265_v34  ;;  %v2270_v37 = vadd.f32 %v1486_v35, %v2157_v60  ;;  %v854_v8 = vpop.xlane.xlu1 %853 }
 0x646   :  { %v855_v42 = vcvt.f32.s32 %v854_v8 }
 0x647   :  { %vm888_vm13 = vcmp.eq.s32.totalorder %v2022_v27, %v802_v36 }
 0x648   :  { %v858_v45 = vadd.s32 %v857_v1, %v855_v42  ;;  %v2274_v46 = vsel %vm888_vm13, inf, %v2165_v5  ;;  %v1487_v57 = vsel %vm888_vm13, 1.0, %v1832_v4 }
 0x649   :  { %929 = vmin.xlane.f32.xlu0 %v2274_v46  ;;  %v2279_v15 = vadd.f32 %v1487_v57, %v2173_v11  ;;  %v840_v60 = vpop.xlane.xlu1 %839 }
 0x64a   :  { %v841_v54 = vcvt.f32.s32 %v840_v60  ;;  %v812_v21 = vpop.xlane.xlu0 %811  ;;  %vm892_vm10 = vcmp.eq.s32.totalorder %v2022_v27, %v858_v45 }
 0x64b   :  { %v813_v59 = vcvt.f32.s32 %v812_v21  ;;  %v2283_v5 = vsel %vm892_vm10, inf, %v2177_v13  ;;  %v1491_v61 = vsel %vm892_vm10, 1.0, %v1832_v4 }
 0x64c   :  { %v844_v62 = vadd.s32 %v843_v51, %v841_v54  ;;  %937 = vmin.xlane.f32.xlu1 %v2283_v5  ;;  %v2288_v11 = vadd.f32 %v1491_v61, %v2181_v29 }
 0x64d   :  { %v816_v14 = vadd.s32 %v815_v58, %v813_v59  ;;  %v868_v2 = vpop.xlane.xlu1 %867 }
 0x64e   :  { %v869_v43 = vcvt.f32.s32 %v868_v2  ;;  %v826_v48 = vpop.xlane.xlu0 %825  ;;  %vm891_vm14 = vcmp.eq.s32.totalorder %v2022_v27, %v844_v62 }
 0x64f   :  { %v827_v13 = vcvt.f32.s32 %v826_v48  ;;  %v2293_v6 = vsel %vm891_vm14, inf, %v2194_v38  ;;  %v1490_v7 = vsel %vm891_vm14, 1.0, %v1832_v4  ;;  %vm889_vm15 = vcmp.eq.s32.totalorder %v2022_v27, %v816_v14 }
 0x650   :  { %v872_v29 = vadd.s32 %v871_v63, %v869_v43  ;;  %935 = vmin.xlane.f32.xlu1 %v2293_v6  ;;  %v2299_v10 = vadd.f32 %v1490_v7, %v2199_v40  ;;  %v2302_v17 = vsel %vm889_vm15, inf, %v2202_v41  ;;  %v1488_v20 = vsel %vm889_vm15, 1.0, %v1832_v4 }
 0x651   :  { %v830_v49 = vadd.s32 %v829_v26, %v827_v13  ;;  %931 = vmin.xlane.f32.xlu0 %v2302_v17  ;;  %v2307_v38 = vadd.f32 %v1488_v20, %v2206_v44  ;;  %v882_v18 = vpop.xlane.xlu1 %881 }
 0x652   :  { %v883_v9 = vcvt.f32.s32 %v882_v18  ;;  %vm893_vm0 = vcmp.eq.s32.totalorder %v2022_v27, %v872_v29 }
 0x653   :  { %v2311_v24 = vsel %vm893_vm0, inf, %v2218_v50  ;;  %v1492_v40 = vsel %vm893_vm0, 1.0, %v1832_v4  ;;  %vm890_vm1 = vcmp.eq.s32.totalorder %v2022_v27, %v830_v49 }
 0x654   :  { %v886_v41 = vadd.s32 %v885_v23, %v883_v9  ;;  %939 = vmin.xlane.f32.xlu1 %v2311_v24  ;;  %v2317_v55 = vadd.f32 %v1492_v40, %v2223_v12  ;;  %v2320_v44 = vsel %vm890_vm1, inf, %v2226_v53  ;;  %v1489_v28 = vsel %vm890_vm1, 1.0, %v1832_v4 }
 0x655   :  { %933 = vmin.xlane.f32.xlu0 %v2320_v44  ;;  %v2325_v50 = vadd.f32 %v1489_v28, %v2230_v16 }
 0x656   :  { %vm894_vm2 = vcmp.eq.s32.totalorder %v2022_v27, %v886_v41 }
 0x657   :  { %v2329_v30 = vsel %vm894_vm2, inf, %v2238_v56  ;;  %v1493_v31 = vsel %vm894_vm2, 1.0, %v1832_v4 }
 0x658   :  { %941 = vmin.xlane.f32.xlu1 %v2329_v30  ;;  %v2334_v12 = vadd.f32 %v1493_v31, %v2242_v22 }
 0x6d2   :  { %v928_v53 = vpop.xlane.xlu0 %927 }
 0x6d3   :  { %vm943_vm11 = vcmp.eq.f32.partialorder %v2265_v34, %v928_v53 }
 0x6d4   :  { %v951_v32 = vsel %vm943_vm11, %v2022_v27, 128 }
 0x6d5   :  { %v960_v0 = vshra.s32 %v951_v32, 16  ;;  %v959_v43 = vand.u32 65535, %v951_v32 }
 0x6d6   :  { %v930_v16 = vpop.xlane.xlu0 %929 }
 0x6d7   :  { %vm944_vm12 = vcmp.eq.f32.partialorder %v2274_v46, %v930_v16  ;;  %v962_v25 = vcvt.s32.f32 %v960_v0  ;;  %v961_v7 = vcvt.s32.f32 %v959_v43 }
 0x6d8   :  { %v952_v56 = vsel %vm944_vm12, %v2022_v27, 128 }
 0x6d9   :  { %963 = vmin.xlane.f32.xlu0 %v962_v25  ;;  %v938_v33 = vpop.xlane.xlu1 %937  ;;  %v974_v35 = vshra.s32 %v952_v56, 16  ;;  %v973_v48 = vand.u32 65535, %v952_v56 }
 0x6da   :  { %vm948_vm3 = vcmp.eq.f32.partialorder %v2283_v5, %v938_v33 }
 0x6db   :  { %v956_v22 = vsel %vm948_vm3, %v2022_v27, 128  ;;  %v976_v36 = vcvt.s32.f32 %v974_v35  ;;  %v975_v18 = vcvt.s32.f32 %v973_v48 }
 0x6dc   :  { %v1030_v8 = vshra.s32 %v956_v22, 16  ;;  %v1029_v20 = vand.u32 65535, %v956_v22 }
 0x6dd   :  { %977 = vmin.xlane.f32.xlu0 %v976_v36  ;;  %v936_v1 = vpop.xlane.xlu1 %935 }
 0x6de   :  { %vm947_vm4 = vcmp.eq.f32.partialorder %v2293_v6, %v936_v1  ;;  %v932_v39 = vpop.xlane.xlu0 %931  ;;  %v1032_v42 = vcvt.s32.f32 %v1030_v8  ;;  %v1031_v41 = vcvt.s32.f32 %v1029_v20 }
 0x6df   :  { %v955_v19 = vsel %vm947_vm4, %v2022_v27, 128  ;;  %vm945_vm5 = vcmp.eq.f32.partialorder %v2302_v17, %v932_v39 }
 0x6e0   :  { %v953_v45 = vsel %vm945_vm5, %v2022_v27, 128  ;;  %1033 = vmin.xlane.f32.xlu1 %v1032_v42  ;;  %v1016_v57 = vshra.s32 %v955_v19, 16  ;;  %v1015_v9 = vand.u32 65535, %v955_v19 }
 0x6e1   :  { %v940_v47 = vpop.xlane.xlu1 %939  ;;  %v988_v60 = vshra.s32 %v953_v45, 16  ;;  %v987_v28 = vand.u32 65535, %v953_v45 }
 0x6e2   :  { %vm949_vm6 = vcmp.eq.f32.partialorder %v2311_v24, %v940_v47  ;;  %v934_v51 = vpop.xlane.xlu0 %933  ;;  %v1018_v52 = vcvt.s32.f32 %v1016_v57  ;;  %v1017_v0 = vcvt.s32.f32 %v1015_v9 }
 0x6e3   :  { %v957_v54 = vsel %vm949_vm6, %v2022_v27, 128  ;;  %vm946_vm7 = vcmp.eq.f32.partialorder %v2320_v44, %v934_v51  ;;  %v990_v21 = vcvt.s32.f32 %v988_v60  ;;  %v989_v56 = vcvt.s32.f32 %v987_v28 }
 0x6e4   :  { %v954_v58 = vsel %vm946_vm7, %v2022_v27, 128  ;;  %1019 = vmin.xlane.f32.xlu1 %v1018_v52  ;;  %v1044_v59 = vshra.s32 %v957_v54, 16  ;;  %v1043_v53 = vand.u32 65535, %v957_v54 }
 0x6e5   :  { %991 = vmin.xlane.f32.xlu0 %v990_v21  ;;  %v942_v61 = vpop.xlane.xlu1 %941  ;;  %v1002_v62 = vshra.s32 %v954_v58, 16  ;;  %v1001_v16 = vand.u32 65535, %v954_v58 }
 0x6e6   :  { %vm950_vm8 = vcmp.eq.f32.partialorder %v2329_v30, %v942_v61  ;;  %v1046_v63 = vcvt.s32.f32 %v1044_v59  ;;  %v1045_v8 = vcvt.s32.f32 %v1043_v53 }
 0x6e7   :  { %v958_v14 = vsel %vm950_vm8, %v2022_v27, 128  ;;  %v1004_v2 = vcvt.s32.f32 %v1002_v62  ;;  %v1003_v39 = vcvt.s32.f32 %v1001_v16 }
 0x6e8   :  { %1047 = vmin.xlane.f32.xlu1 %v1046_v63  ;;  %v1058_v26 = vshra.s32 %v958_v14, 16  ;;  %v1057_v22 = vand.u32 65535, %v958_v14 }
 0x6e9   :  { %1005 = vmin.xlane.f32.xlu0 %v1004_v2 }
 0x6ea   :  { %v1060_v3 = vcvt.s32.f32 %v1058_v26  ;;  %v1059_v57 = vcvt.s32.f32 %v1057_v22 }
 0x6ec   :  { %1061 = vmin.xlane.f32.xlu1 %v1060_v3 }
 0x766   :  { %v964_v13 = vpop.xlane.xlu0 %963 }
 0x767   :  { %vm965_vm9 = vcmp.eq.f32.partialorder %v962_v25, %v964_v13  ;;  %v970_v60 = vcvt.f32.s32 %v964_v13 }
 0x768   :  { %v966_v29 = vsel %vm965_vm9, %v961_v7, inf }
 0x769   :  { %967 = vmin.xlane.f32.xlu0 %v966_v29 }
 0x76a   :  { %v978_v49 = vpop.xlane.xlu0 %977 }
 0x76b   :  { %vm979_vm13 = vcmp.eq.f32.partialorder %v976_v36, %v978_v49  ;;  %v984_v54 = vcvt.f32.s32 %v978_v49 }
 0x76c   :  { %v980_v23 = vsel %vm979_vm13, %v975_v18, inf }
 0x76d   :  { %981 = vmin.xlane.f32.xlu0 %v980_v23  ;;  %v1034_v40 = vpop.xlane.xlu1 %1033  ;;  %v985_v62 = vshll.u32 %v984_v54, 16 }
 0x76e   :  { %vm1035_vm10 = vcmp.eq.f32.partialorder %v1032_v42, %v1034_v40  ;;  %v1040_v59 = vcvt.f32.s32 %v1034_v40 }
 0x76f   :  { %v1036_v31 = vsel %vm1035_vm10, %v1031_v41, inf }
 0x770   :  { %1037 = vmin.xlane.f32.xlu1 %v1036_v31  ;;  %v1041_v48 = vshll.u32 %v1040_v59, 16 }
 0x771   :  { %v1020_v32 = vpop.xlane.xlu1 %1019 }
 0x772   :  { %v992_v25 = vpop.xlane.xlu0 %991  ;;  %vm1021_vm14 = vcmp.eq.f32.partialorder %v1018_v52, %v1020_v32  ;;  %v971_v52 = vshll.u32 %v970_v60, 16  ;;  %v1026_v13 = vcvt.f32.s32 %v1020_v32 }
 0x773   :  { %v1022_v33 = vsel %vm1021_vm14, %v1017_v0, inf  ;;  %vm993_vm15 = vcmp.eq.f32.partialorder %v990_v21, %v992_v25  ;;  %v998_v29 = vcvt.f32.s32 %v992_v25 }
 0x774   :  { %1023 = vmin.xlane.f32.xlu1 %v1022_v33  ;;  %v994_v35 = vsel %vm993_vm15, %v989_v56, inf  ;;  %v1027_v9 = vshll.u32 %v1026_v13, 16 }
 0x775   :  { %995 = vmin.xlane.f32.xlu0 %v994_v35  ;;  %v1048_v36 = vpop.xlane.xlu1 %1047  ;;  %v999_v31 = vshll.u32 %v998_v29, 16 }
 0x776   :  { %v1006_v1 = vpop.xlane.xlu0 %1005  ;;  %vm1049_vm0 = vcmp.eq.f32.partialorder %v1046_v63, %v1048_v36  ;;  %v1054_v18 = vcvt.f32.s32 %v1048_v36 }
 0x777   :  { %v1050_v42 = vsel %vm1049_vm0, %v1045_v8, inf  ;;  %vm1007_vm1 = vcmp.eq.f32.partialorder %v1004_v2, %v1006_v1  ;;  %v1012_v40 = vcvt.f32.s32 %v1006_v1 }
 0x778   :  { %1051 = vmin.xlane.f32.xlu1 %v1050_v42  ;;  %v1008_v19 = vsel %vm1007_vm1, %v1003_v39, inf }
 0x779   :  { %1009 = vmin.xlane.f32.xlu0 %v1008_v19  ;;  %v2352_v45 = vpop.xlane.xlu1 %1061  ;;  %v1013_v33 = vshll.u32 %v1012_v40, 16 }
 0x77a   :  { %vm1063_vm2 = vcmp.eq.f32.partialorder %v1060_v3, %v2352_v45  ;;  %v1068_v35 = vcvt.f32.s32 %v2352_v45 }
 0x77b   :  { %v1064_v47 = vsel %vm1063_vm2, %v1059_v57, inf }
 0x77c   :  { %1065 = vmin.xlane.f32.xlu1 %v1064_v47 }
 0x7f6   :  { %v968_v51 = vpop.xlane.xlu0 %967 }
 0x7f7   :  { %v969_v21 = vcvt.f32.s32 %v968_v51 }
 0x7f9   :  { %v972_v58 = vadd.s32 %v971_v52, %v969_v21 }
 0x7fa   :  { %v982_v61 = vpop.xlane.xlu0 %981 }
 0x7fb   :  { %v983_v63 = vcvt.f32.s32 %v982_v61  ;;  %vm1071_vm11 = vcmp.eq.s32.totalorder %v2022_v27, %v972_v58 }
 0x7fc   :  { %v2357_v14 = vsel %vm1071_vm11, inf, %v2265_v34  ;;  %v1494_v2 = vsel %vm1071_vm11, 1.0, %v1832_v4 }
 0x7fd   :  { %v986_v26 = vadd.s32 %v985_v62, %v983_v63  ;;  %1111 = vmin.xlane.f32.xlu0 %v2357_v14  ;;  %v2362_v3 = vadd.f32 %v1494_v2, %v2270_v37  ;;  %v1038_v43 = vpop.xlane.xlu1 %1037 }
 0x7fe   :  { %v1039_v7 = vcvt.f32.s32 %v1038_v43 }
 0x7ff   :  { %vm1072_vm12 = vcmp.eq.s32.totalorder %v2022_v27, %v986_v26 }
 0x800   :  { %v1042_v20 = vadd.s32 %v1041_v48, %v1039_v7  ;;  %v2366_v49 = vsel %vm1072_vm12, inf, %v2274_v46  ;;  %v1495_v34 = vsel %vm1072_vm12, 1.0, %v1832_v4 }
 0x801   :  { %1113 = vmin.xlane.f32.xlu0 %v2366_v49  ;;  %v2371_v23 = vadd.f32 %v1495_v34, %v2279_v15  ;;  %v1024_v37 = vpop.xlane.xlu1 %1023  ;;  %v1055_v15 = vshll.u32 %v1054_v18, 16 }
 0x802   :  { %v1025_v41 = vcvt.f32.s32 %v1024_v37  ;;  %v996_v28 = vpop.xlane.xlu0 %995  ;;  %vm1076_vm3 = vcmp.eq.s32.totalorder %v2022_v27, %v1042_v20 }
 0x803   :  { %v997_v53 = vcvt.f32.s32 %v996_v28  ;;  %v1108_v46 = vsel %vm1076_vm3, inf, %v2283_v5  ;;  %v1499_v32 = vsel %vm1076_vm3, 1.0, %v1832_v4 }
 0x804   :  { %v1028_v0 = vadd.s32 %v1027_v9, %v1025_v41  ;;  %1121 = vmin.xlane.f32.xlu1 %v1108_v46  ;;  %v2377_v16 = vadd.f32 %v1499_v32, %v2288_v11 }
 0x805   :  { %v1000_v25 = vadd.s32 %v999_v31, %v997_v53  ;;  %v1052_v56 = vpop.xlane.xlu1 %1051 }
 0x806   :  { %v1053_v22 = vcvt.f32.s32 %v1052_v56  ;;  %v1010_v36 = vpop.xlane.xlu0 %1009  ;;  %vm1075_vm4 = vcmp.eq.s32.totalorder %v2022_v27, %v1028_v0  ;;  %v1287_v56 = vld [vmem:[%s2622_s2] sm:$0xff] }
 0x807   :  { %v1011_v8 = vcvt.f32.s32 %v1010_v36  ;;  %v1107_v5 = vsel %vm1075_vm4, inf, %v2293_v6  ;;  %v1498_v1 = vsel %vm1075_vm4, 1.0, %v1832_v4  ;;  %vm1073_vm5 = vcmp.eq.s32.totalorder %v2022_v27, %v1000_v25  ;;  %v1290_v36 = vld [vmem:[%s2622_s2 + $0x18] sm:$0xff] }
 0x808   :  { %v1056_v39 = vadd.s32 %v1055_v15, %v1053_v22  ;;  %1119 = vmin.xlane.f32.xlu1 %v1107_v5  ;;  %v2385_v11 = vadd.f32 %v1498_v1, %v2299_v10  ;;  %v1105_v42 = vsel %vm1073_vm5, inf, %v2302_v17  ;;  %v1496_v19 = vsel %vm1073_vm5, 1.0, %v1832_v4  ;;  %v1292_v1 = vld [vmem:[%s2622_s2 + $0x28] sm:$0xff] }
 0x809   :  { %v1014_v45 = vadd.s32 %v1013_v33, %v1011_v8  ;;  %1115 = vmin.xlane.f32.xlu0 %v1105_v42  ;;  %v2390_v57 = vadd.f32 %v1496_v19, %v2307_v38  ;;  %v1066_v47 = vpop.xlane.xlu1 %1065  ;;  %v1069_v6 = vshll.u32 %v1068_v35, 16  ;;  %v1288_v33 = vld [vmem:[%s2622_s2 + $0x8] sm:$0xff]  ;;  %v1289_v35 = vld [vmem:[%s2622_s2 + $0x10] sm:$0xff]  ;;  %v1294_v19 = vld [vmem:[%s2622_s2 + $0x38] sm:$0xff] }
 0x80a   :  { %v1067_v60 = vcvt.f32.s32 %v1066_v47  ;;  %vm1077_vm6 = vcmp.eq.s32.totalorder %v2022_v27, %v1056_v39  ;;  %v1778_v22 = vpack.c.bf16 %v1288_v33, %v1287_v56  ;;  %v1782_v8 = vpack.c.bf16 %v1290_v36, %v1289_v35  ;;  %v1295_v47 = vld [vmem:[%s2622_s2 + $0x40] sm:$0xff]  ;;  %v1301_v56 = vld [vmem:[%s2622_s2 + $0x70] sm:$0xff]  ;;  %v1302_v33 = vld [vmem:[%s2622_s2 + $0x78] sm:$0xff] }
 0x80b   :  { %v1109_v51 = vsel %vm1077_vm6, inf, %v2311_v24  ;;  %v1500_v52 = vsel %vm1077_vm6, 1.0, %v1832_v4  ;;  %vm1074_vm7 = vcmp.eq.s32.totalorder %v2022_v27, %v1014_v45  ;;  %v1806_v35 = vpack.c.bf16 %v1302_v33, %v1301_v56 }
 0x80c   :  { %v1070_v10 = vadd.s32 %v1069_v6, %v1067_v60  ;;  %1123 = vmin.xlane.f32.xlu1 %v1109_v51  ;;  %v2397_v17 = vadd.f32 %v1500_v52, %v2317_v55  ;;  %v1106_v54 = vsel %vm1074_vm7, inf, %v2320_v44  ;;  %v1497_v38 = vsel %vm1074_vm7, 1.0, %v1832_v4  ;;  %1779 = vmatprep.subr.bf16.mxu0 %v1778_v22  ;;  %v1296_v6 = vld [vmem:[%s2622_s2 + $0x48] sm:$0xff] }
 0x80d   :  { %1117 = vmin.xlane.f32.xlu0 %v1106_v54  ;;  %v2402_v21 = vadd.f32 %v1497_v38, %v2325_v50  ;;  %1810 = vmatprep.subr.bf16.mxu1 %v1778_v22  ;;  %v1794_v60 = vpack.c.bf16 %v1296_v6, %v1295_v47 }
 0x80e   :  { %vm1078_vm8 = vcmp.eq.s32.totalorder %v2022_v27, %v1070_v10  ;;  %1781 = vmatpush3.bf16.msra.mxu0 %v1778_v22  ;;  %1818 = vmatpush3.bf16.msra.mxu1 %v1778_v22 }
 0x80f   :  { %v1110_v24 = vsel %vm1078_vm8, inf, %v2329_v30  ;;  %v1501_v58 = vsel %vm1078_vm8, 1.0, %v1832_v4  ;;  %1783 = vmatprep.subr.bf16.mxu0 %v1782_v8  ;;  %1811 = vmatprep.subr.bf16.mxu1 %v1782_v8 }
 0x810   :  { %1125 = vmin.xlane.f32.xlu1 %v1110_v24  ;;  %v2408_v59 = vadd.f32 %v1501_v58, %v2334_v12 }
 0x812   :  { %1785 = vmatpush3.bf16.msra.mxu0 %v1782_v8  ;;  %1819 = vmatpush3.bf16.msra.mxu1 %v1782_v8 }
 0x88a   :  { %v1112_v55 = vpop.xlane.xlu0 %1111 }
 0x88b   :  { %vm1127_vm9 = vcmp.eq.f32.partialorder %v2357_v14, %v1112_v55 }
 0x88c   :  { %v2412_v44 = vsel %vm1127_vm9, %v2022_v27, 128 }
 0x88d   :  { %v1144_v61 = vshra.s32 %v2412_v44, 16 }
 0x88e   :  { %v1114_v50 = vpop.xlane.xlu0 %1113 }
 0x88f   :  { %v2415_v62 = vcvt.s32.f32 %v1144_v61  ;;  %vm1128_vm13 = vcmp.eq.f32.partialorder %v2366_v49, %v1114_v50 }
 0x890   :  { %v2419_v30 = vsel %vm1128_vm13, %v2022_v27, 128 }
 0x891   :  { %v1158_v63 = vshra.s32 %v2419_v30, 16  ;;  %1147 = vmin.xlane.f32.xlu0 %v2415_v62  ;;  %v1122_v12 = vpop.xlane.xlu1 %1121  ;;  %v1157_v10 = vand.u32 65535, %v2419_v30 }
 0x892   :  { %vm1132_vm10 = vcmp.eq.f32.partialorder %v1108_v46, %v1122_v12 }
 0x893   :  { %v2423_v14 = vcvt.s32.f32 %v1158_v63  ;;  %v2426_v2 = vsel %vm1132_vm10, %v2022_v27, 128  ;;  %v1159_v58 = vcvt.s32.f32 %v1157_v10 }
 0x894   :  { %v1214_v26 = vshra.s32 %v2426_v2, 16 }
 0x895   :  { %1161 = vmin.xlane.f32.xlu0 %v2423_v14  ;;  %v1120_v43 = vpop.xlane.xlu1 %1119 }
 0x896   :  { %v2430_v48 = vcvt.s32.f32 %v1214_v26  ;;  %vm1131_vm14 = vcmp.eq.f32.partialorder %v1107_v5, %v1120_v43  ;;  %v1116_v13 = vpop.xlane.xlu0 %1115  ;;  %v1291_v5 = vld [vmem:[%s2622_s2 + $0x20] sm:$0xff] }
 0x897   :  { %v2433_v7 = vsel %vm1131_vm14, %v2022_v27, 128  ;;  %vm1129_vm15 = vcmp.eq.f32.partialorder %v1105_v42, %v1116_v13  ;;  %v1786_v39 = vpack.c.bf16 %v1292_v1, %v1291_v5  ;;  %v1293_v42 = vld [vmem:[%s2622_s2 + $0x30] sm:$0xff] }
 0x898   :  { %v1200_v29 = vshra.s32 %v2433_v7, 16  ;;  %v2437_v20 = vsel %vm1129_vm15, %v2022_v27, 128  ;;  %1217 = vmin.xlane.f32.xlu1 %v2430_v48  ;;  %v1790_v45 = vpack.c.bf16 %v1294_v19, %v1293_v42  ;;  %v1199_v50 = vand.u32 65535, %v2433_v7 }
 0x899   :  { %v1172_v49 = vshra.s32 %v2437_v20, 16  ;;  %v1124_v34 = vpop.xlane.xlu1 %1123  ;;  %1787 = vmatprep.subr.bf16.mxu0 %v1786_v39  ;;  %1812 = vmatprep.subr.bf16.mxu1 %v1786_v39  ;;  %v1171_v63 = vand.u32 65535, %v2437_v20 }
 0x89a   :  { %v2441_v18 = vcvt.s32.f32 %v1200_v29  ;;  %vm1133_vm0 = vcmp.eq.f32.partialorder %v1109_v51, %v1124_v34  ;;  %v1118_v37 = vpop.xlane.xlu0 %1117  ;;  %1789 = vmatpush3.bf16.msra.mxu0 %v1786_v39  ;;  %1820 = vmatpush3.bf16.msra.mxu1 %v1786_v39  ;;  %v1143_v51 = vand.u32 65535, %v2412_v44  ;;  %v1201_v12 = vcvt.s32.f32 %v1199_v50  ;;  %v1297_v34 = vld [vmem:[%s2622_s2 + $0x50] sm:$0xff] }
 0x89b   :  { %v2443_v9 = vcvt.s32.f32 %v1172_v49  ;;  %v2446_v40 = vsel %vm1133_vm0, %v2022_v27, 128  ;;  %vm1130_vm1 = vcmp.eq.f32.partialorder %v1106_v54, %v1118_v37  ;;  %1791 = vmatprep.subr.bf16.mxu0 %v1790_v45  ;;  %1813 = vmatprep.subr.bf16.mxu1 %v1790_v45 }
 0x89c   :  { %v1228_v41 = vshra.s32 %v2446_v40, 16  ;;  %v2450_v28 = vsel %vm1130_vm1, %v2022_v27, 128  ;;  %1203 = vmin.xlane.f32.xlu1 %v2441_v18  ;;  %v1145_v52 = vcvt.s32.f32 %v1143_v51 }
 0x89d   :  { %v1186_v31 = vshra.s32 %v2450_v28, 16  ;;  %1175 = vmin.xlane.f32.xlu0 %v2443_v9  ;;  %v1126_v53 = vpop.xlane.xlu1 %1125  ;;  %v1185_v43 = vand.u32 65535, %v2450_v28 }
 0x89e   :  { %v2455_v46 = vcvt.s32.f32 %v1228_v41  ;;  %vm1134_vm2 = vcmp.eq.f32.partialorder %v1110_v24, %v1126_v53  ;;  %1793 = vmatpush3.bf16.msra.mxu0 %v1790_v45  ;;  %1821 = vmatpush3.bf16.msra.mxu1 %v1790_v45  ;;  %v1213_v24 = vand.u32 65535, %v2426_v2  ;;  %v1227_v2 = vand.u32 65535, %v2446_v40 }
 0x89f   :  { %v2457_v32 = vcvt.s32.f32 %v1186_v31  ;;  %v2460_v0 = vsel %vm1134_vm2, %v2022_v27, 128  ;;  %1795 = vmatprep.subr.bf16.mxu0 %v1794_v60  ;;  %1814 = vmatprep.subr.bf16.mxu1 %v1794_v60  ;;  %v1187_v37 = vcvt.s32.f32 %v1185_v43 }
 0x8a0   :  { %v1242_v15 = vshra.s32 %v2460_v0, 16  ;;  %1231 = vmin.xlane.f32.xlu1 %v2455_v46  ;;  %v1215_v44 = vcvt.s32.f32 %v1213_v24  ;;  %v1229_v29 = vcvt.s32.f32 %v1227_v2  ;;  %v1241_v20 = vand.u32 65535, %v2460_v0  ;;  %v1299_v0 = vld [vmem:[%s2622_s2 + $0x60] sm:$0xff] }
 0x8a1   :  { %1189 = vmin.xlane.f32.xlu0 %v2457_v32 }
 0x8a2   :  { %v2465_v25 = vcvt.s32.f32 %v1242_v15  ;;  %1797 = vmatpush3.bf16.msra.mxu0 %v1794_v60  ;;  %1822 = vmatpush3.bf16.msra.mxu1 %v1794_v60  ;;  %v1243_v31 = vcvt.s32.f32 %v1241_v20 }
 0x8a4   :  { %1245 = vmin.xlane.f32.xlu1 %v2465_v25 }
 0x91e   :  { %v2500_v54 = vpop.xlane.xlu0 %1147 }
 0x91f   :  { %vm1149_vm11 = vcmp.eq.f32.partialorder %v2415_v62, %v2500_v54 }
 0x920   :  { %v1150_v38 = vsel %vm1149_vm11, %v1145_v52, inf  ;;  %vm1416_vm11 = vcmask 64512  }
 0x921   :  { %1151 = vmin.xlane.f32.xlu0 %v1150_v38 }
 0x922   :  { %v2505_v55 = vpop.xlane.xlu0 %1161 }
 0x923   :  { %vm1163_vm12 = vcmp.eq.f32.partialorder %v2423_v14, %v2505_v55  ;;  %v1173_v14 = vcvt.s32.f32 %v1171_v63  ;;  %v1168_v8 = vcvt.f32.s32 %v2505_v55 }
 0x924   :  { %v1164_v61 = vsel %vm1163_vm12, %v1159_v58, inf }
 0x925   :  { %1165 = vmin.xlane.f32.xlu0 %v1164_v61  ;;  %v2510_v30 = vpop.xlane.xlu1 %1217  ;;  %v1169_v19 = vshll.u32 %v1168_v8, 16 }
 0x926   :  { %vm1219_vm3 = vcmp.eq.f32.partialorder %v2430_v48, %v2510_v30  ;;  %v1224_v39 = vcvt.f32.s32 %v2510_v30 }
 0x927   :  { %v1220_v62 = vsel %vm1219_vm3, %v1215_v44, inf }
 0x928   :  { %1221 = vmin.xlane.f32.xlu1 %v1220_v62  ;;  %v1225_v52 = vshll.u32 %v1224_v39, 16 }
 0x929   :  { %v2516_v26 = vpop.xlane.xlu1 %1203 }
 0x92a   :  { %vm1205_vm4 = vcmp.eq.f32.partialorder %v2441_v18, %v2516_v26  ;;  %v2521_v13 = vpop.xlane.xlu0 %1175  ;;  %v1298_v18 = vld [vmem:[%s2622_s2 + $0x58] sm:$0xff]  ;;  %v1210_v10 = vcvt.f32.s32 %v2516_v26 }
 0x92b   :  { %vm1177_vm5 = vcmp.eq.f32.partialorder %v2443_v9, %v2521_v13  ;;  %v1206_v7 = vsel %vm1205_vm4, %v1201_v12, inf  ;;  %v1798_v40 = vpack.c.bf16 %v1298_v18, %v1297_v34  ;;  %v1182_v38 = vcvt.f32.s32 %v2521_v13 }
 0x92c   :  { %1207 = vmin.xlane.f32.xlu1 %v1206_v7  ;;  %v1178_v48 = vsel %vm1177_vm5, %v1173_v14, inf  ;;  %v1211_v44 = vshll.u32 %v1210_v10, 16 }
 0x92d   :  { %1179 = vmin.xlane.f32.xlu0 %v1178_v48  ;;  %v2526_v49 = vpop.xlane.xlu1 %1231  ;;  %1799 = vmatprep.subr.bf16.mxu0 %v1798_v40  ;;  %v1183_v63 = vshll.u32 %v1182_v38, 16 }
 0x92e   :  { %vm1233_vm6 = vcmp.eq.f32.partialorder %v2455_v46, %v2526_v49  ;;  %v2536_v9 = vpop.xlane.xlu0 %1189  ;;  %1801 = vmatpush3.bf16.msra.mxu0 %v1798_v40  ;;  %v1300_v46 = vld [vmem:[%s2622_s2 + $0x68] sm:$0xff]  ;;  %1815 = vmatprep.subr.bf16.mxu1 %v1798_v40  ;;  %v1238_v50 = vcvt.f32.s32 %v2526_v49 }
 0x92f   :  { %vm1191_vm7 = vcmp.eq.f32.partialorder %v2457_v32, %v2536_v9  ;;  %v1234_v41 = vsel %vm1233_vm6, %v1229_v29, inf  ;;  %v1802_v32 = vpack.c.bf16 %v1300_v46, %v1299_v0  ;;  %1823 = vmatpush3.bf16.msra.mxu1 %v1798_v40  ;;  %v1196_v62 = vcvt.f32.s32 %v2536_v9 }
 0x930   :  { %1235 = vmin.xlane.f32.xlu1 %v1234_v41  ;;  %v1192_v28 = vsel %vm1191_vm7, %v1187_v37, inf  ;;  %v1239_v13 = vshll.u32 %v1238_v50, 16 }
 0x931   :  { %1193 = vmin.xlane.f32.xlu0 %v1192_v28  ;;  %v2540_v53 = vpop.xlane.xlu1 %1245  ;;  %1803 = vmatprep.subr.bf16.mxu0 %v1802_v32  ;;  %v1197_v20 = vshll.u32 %v1196_v62, 16 }
 0x932   :  { %vm1247_vm8 = vcmp.eq.f32.partialorder %v2465_v25, %v2540_v53  ;;  %1805 = vmatpush3.bf16.msra.mxu0 %v1802_v32  ;;  %1816 = vmatprep.subr.bf16.mxu1 %v1802_v32  ;;  %v1154_v25 = vcvt.f32.s32 %v2500_v54  ;;  %v1252_v7 = vcvt.f32.s32 %v2540_v53 }
 0x933   :  { %v1248_v15 = vsel %vm1247_vm8, %v1243_v31, inf  ;;  %1824 = vmatpush3.bf16.msra.mxu1 %v1802_v32  ;;  %1807 = vmatprep.subr.bf16.mxu0 %v1806_v35 }
 0x934   :  { %1249 = vmin.xlane.f32.xlu1 %v1248_v15  ;;  %1817 = vmatprep.subr.bf16.mxu1 %v1806_v35  ;;  %v1155_v36 = vshll.u32 %v1154_v25, 16  ;;  %v1253_v28 = vshll.u32 %v1252_v7, 16 }
 0x936   :  { %1809 = vmatpush3.bf16.msra.mxu0 %v1806_v35 }
 0x937   :  { %1825 = vmatpush3.bf16.msra.mxu1 %v1806_v35 }
 0x9ae   :  { %v1152_v22 = vpop.xlane.xlu0 %1151 }
 0x9af   :  { %v1153_v5 = vcvt.f32.s32 %v1152_v22 }
 0x9b1   :  { %v1156_v1 = vadd.s32 %v1155_v36, %v1153_v5 }
 0x9b2   :  { %v1166_v42 = vpop.xlane.xlu0 %1165 }
 0x9b3   :  { %vm1255_vm9 = vcmp.eq.s32.totalorder %v2022_v27, %v1156_v1  ;;  %v1167_v45 = vcvt.f32.s32 %v1166_v42 }
 0x9b4   :  { %v1502_v47 = vsel %vm1255_vm9, 1.0, %v1832_v4 }
 0x9b5   :  { %v1170_v6 = vadd.s32 %v1169_v19, %v1167_v45  ;;  %v1222_v60 = vpop.xlane.xlu1 %1221  ;;  %v1279_v51 = vadd.f32 %v1502_v47, %v2362_v3 }
 0x9b6   :  { %v1223_v54 = vcvt.f32.s32 %v1222_v60 }
 0x9b7   :  { %vm1256_vm13 = vcmp.eq.s32.totalorder %v2022_v27, %v1170_v6  ;;  %1686 = vmatprep.mubr.f32.mxu0 %v1279_v51 }
 0x9b8   :  { %v1503_v24 = vsel %vm1256_vm13, 1.0, %v1832_v4  ;;  %v1226_v58 = vadd.s32 %v1225_v52, %v1223_v54 }
 0x9b9   :  { %v1280_v55 = vadd.f32 %v1503_v24, %v2371_v23  ;;  %v1208_v61 = vpop.xlane.xlu1 %1207 }
 0x9ba   :  { %vm1260_vm10 = vcmp.eq.s32.totalorder %v2022_v27, %v1226_v58  ;;  %v1209_v3 = vcvt.f32.s32 %v1208_v61  ;;  %v1180_v30 = vpop.xlane.xlu0 %1179 }
 0x9bb   :  { %v1507_v12 = vsel %vm1260_vm10, 1.0, %v1832_v4  ;;  %v1181_v2 = vcvt.f32.s32 %v1180_v30  ;;  %1687 = vmatmul.mubr.f32.vlgmr.msra.gmra.mrb[8].mxu0 %v1280_v55 }
 0x9bc   :  { %v1284_v26 = vadd.f32 %v1507_v12, %v2377_v16  ;;  %v1212_v14 = vadd.s32 %v1211_v44, %v1209_v3 }
 0x9bd   :  { %v1184_v43 = vadd.s32 %v1183_v63, %v1181_v2  ;;  %v1236_v23 = vpop.xlane.xlu1 %1235 }
 0x9be   :  { %vm1259_vm14 = vcmp.eq.s32.totalorder %v2022_v27, %v1212_v14  ;;  %v1237_v48 = vcvt.f32.s32 %v1236_v23  ;;  %v1194_v29 = vpop.xlane.xlu0 %1193 }
 0x9bf   :  { %vm1257_vm15 = vcmp.eq.s32.totalorder %v2022_v27, %v1184_v43  ;;  %v1195_v49 = vcvt.f32.s32 %v1194_v29  ;;  %v1506_v34 = vsel %vm1259_vm14, 1.0, %v1832_v4 }
 0x9c0   :  { %v1240_v18 = vadd.s32 %v1239_v13, %v1237_v48  ;;  %v1283_v37 = vadd.f32 %v1506_v34, %v2385_v11  ;;  %v1504_v16 = vsel %vm1257_vm15, 1.0, %v1832_v4 }
 0x9c1   :  { %v1198_v9 = vadd.s32 %v1197_v20, %v1195_v49  ;;  %v1250_v40 = vpop.xlane.xlu1 %1249  ;;  %v1281_v41 = vadd.f32 %v1504_v16, %v2390_v57 }
 0x9c2   :  { %vm1261_vm0 = vcmp.eq.s32.totalorder %v2022_v27, %v1240_v18  ;;  %v1251_v31 = vcvt.f32.s32 %v1250_v40  ;;  %1692 = vmatprep.mubr.f32.mxu1 %v1283_v37 }
 0x9c3   :  { %vm1258_vm1 = vcmp.eq.s32.totalorder %v2022_v27, %v1198_v9  ;;  %1689 = vmatprep.mubr.f32.mxu0 %v1281_v41  ;;  %1693 = vmatmul.mubr.f32.vlgmr.msra.gmra.mrb[2].mxu1 %v1284_v26  ;;  %v1508_v53 = vsel %vm1261_vm0, 1.0, %v1832_v4 }
 0x9c4   :  { %v1505_v0 = vsel %vm1258_vm1, 1.0, %v1832_v4  ;;  %v1254_v11 = vadd.s32 %v1253_v28, %v1251_v31  ;;  %v1285_v46 = vadd.f32 %v1508_v53, %v2397_v17 }
 0x9c5   :  { %v1282_v32 = vadd.f32 %v1505_v0, %v2402_v21 }
 0x9c6   :  { %vm1262_vm2 = vcmp.eq.s32.totalorder %v2022_v27, %v1254_v11  ;;  %1695 = vmatprep.mubr.f32.mxu1 %v1285_v46 }
 0x9c7   :  { %v1509_v57 = vsel %vm1262_vm2, 1.0, %v1832_v4  ;;  %1690 = vmatmul.mubr.f32.gmra.mrb[10].mxu0 %v1282_v32 }
 0x9c8   :  { %v1286_v15 = vadd.f32 %v1509_v57, %v2408_v59 }
 0x9ca   :  { %1696 = vmatmul.mubr.f32.gmra.mrb[4].mxu1 %v1286_v15 }
 0xa8e   :  { %v1688_v56 = vpop.f32.mrb[8].mxu0 }
 0xa8f   :  { %v1409_v33 = vmul.f32 0.2, %v1688_v56  ;;  %v1369_v35 = vpop.f32.mrb[9].mxu0 }
 0xa90   :  { %v1408_v25 = vmul.f32 0.2, %v1369_v35 }
 0xa91   :  { %1418 = vst.msk [vmem:[%s2623_s3 + $0x8] sm:$0xff] %vm1416_vm11, %v1409_v33 }
 0xa92   :  { %1417 = vst.msk [vmem:[%s2623_s3] sm:$0xff] %vm1416_vm11, %v1408_v25 }
 0xa96   :  { %v1694_v4 = vpop.f32.mrb[2].mxu1 }
 0xa97   :  { %v1413_v27 = vmul.f32 0.2, %v1694_v4  ;;  %v1389_v17 = vpop.f32.mrb[3].mxu1 }
 0xa98   :  { %v1412_v21 = vmul.f32 0.2, %v1389_v17 }
 0xa99   :  { %1422 = vst.msk [vmem:[%s2623_s3 + $0x28] sm:$0xff] %vm1416_vm11, %v1413_v27 }
 0xa9a   :  { %1421 = vst.msk [vmem:[%s2623_s3 + $0x20] sm:$0xff] %vm1416_vm11, %v1412_v21  ;;  %v1691_v59 = vpop.f32.mrb[10].mxu0 }
 0xa9b   :  { %v1411_v22 = vmul.f32 0.2, %v1691_v59  ;;  %v1379_v36 = vpop.f32.mrb[11].mxu0 }
 0xa9c   :  { %v1410_v8 = vmul.f32 0.2, %v1379_v36 }
 0xa9d   :  { %1420 = vst.msk [vmem:[%s2623_s3 + $0x18] sm:$0xff] %vm1416_vm11, %v1411_v22  ;;  %v1697_v5 = vpop.f32.mrb[4].mxu1 }
 0xa9e   :  { %1419 = vst.msk [vmem:[%s2623_s3 + $0x10] sm:$0xff] %vm1416_vm11, %v1410_v8  ;;  %v1415_v1 = vmul.f32 0.2, %v1697_v5  ;;  %v1399_v39 = vpop.f32.mrb[5].mxu1 }
 0xa9f   :  { %v1414_v42 = vmul.f32 0.2, %v1399_v39 }
 0xaa0   :  { %1424 = vst.msk [vmem:[%s2623_s3 + $0x38] sm:$0xff] %vm1416_vm11, %v1415_v1 }
 0xaa1   :  { %1423 = vst.msk [vmem:[%s2623_s3 + $0x30] sm:$0xff] %vm1416_vm11, %v1414_v42 }

</bundles_post_ra>
